<compile_context>
chip_gen: v6e
topology: v6e:2x2x1
jax: 0.10.0
libtpu: 0.0.40
codegen_flags: <defaults>
</compile_context>

<pallas_src>
import functools

import jax
import jax.numpy as jnp
from jax import lax
from jax.experimental import pallas as pl
from jax.experimental.pallas import tpu as pltpu


# ----------------------------- Pallas kernel ------------------------------- #

def _gnn_fused_kernel(*refs, num_layers, compute_dtype):
    """Fully fused GNN forward.

    Ref layout (all VMEM, full-array blocks, no grid):
      refs[0:7]   : x, ids_padded, row_[E,1], col_[E,1], batch_[1,N], enc_W, enc_b
      next 12*L   : per layer: msg_W1 split into (Wxi, Wxj, Wid_i, Wid_j),
                    msg_b1, msg_W2, msg_b2,
                    upd_W1 split into (Wx, Waggr), upd_b1, upd_W2, upd_b2
      next L+1    : JK weights, zero-padded on the output axis to the lane-dense width
      next 1      : summed (padded) JK bias, shape [1, OUT_PAD]
      refs[-1]    : output, shape [G_PAD, OUT_PAD]
    """
    (x_ref, ids_ref, row_e_ref, col_e_ref, batch_ref,
     enc_w_ref, enc_b_ref) = refs[:7]
    n_fixed = 7
    n_layer_refs = 12 * num_layers
    layer_refs = refs[n_fixed:n_fixed + n_layer_refs]
    jk_w_refs = refs[n_fixed + n_layer_refs:
                     n_fixed + n_layer_refs + num_layers + 1]
    jk_b_ref = refs[n_fixed + n_layer_refs + num_layers + 1]
    o_ref = refs[-1]

    f32 = jnp.float32
    cdt = compute_dtype
    N = x_ref.shape[0]
    E = row_e_ref.shape[0]
    Gp = o_ref.shape[0]

    def dot(a, b):
        # MXU inputs in the compute dtype (bf16 on the fast path), f32 accumulate.
        return jnp.dot(a.astype(cdt), b.astype(cdt), preferred_element_type=f32)

    # One-hot gather & pool matrices built in-register from int32 indices.
    # Entries are exactly 0/1, so casting them to bf16 for the MXU is lossless.
    iota_en = lax.broadcasted_iota(jnp.int32, (E, N), 1)            # [E, N] -> n
    gather_i = jnp.where(iota_en == row_e_ref[...], 1.0, 0.0).astype(cdt)
    gather_j = jnp.where(iota_en == col_e_ref[...], 1.0, 0.0).astype(cdt)
    iota_gn = lax.broadcasted_iota(jnp.int32, (Gp, N), 0)           # [Gp, N] -> g
    pool = jnp.where(iota_gn == batch_ref[...], 1.0, 0.0).astype(cdt)

    ids = ids_ref[...]

    # Input node encoder ('linear').
    x_cur = dot(x_ref[...], enc_w_ref[...]) + enc_b_ref[...]        # f32 [N, d_enc]

    # Jumping-knowledge re-associated to node granularity:
    #   pred = pool @ (sum_i x_interm[i] @ Wjk_pad_i) + sum_i b_pad_i
    y_nodes = dot(x_cur, jk_w_refs[0][...])                          # [N, OUT_PAD]

    for l in range(num_layers):
        (m_wxi, m_wxj, m_wii, m_wij, m_b1, m_w2, m_b2,
         u_wx, u_wa, u_b1, u_w2, u_b2) = layer_refs[12 * l:12 * (l + 1)]

        # Message MLP layer 1, hoisted through the (linear) gather: per-node
        # projections at M=N, then two one-hot gather matmuls at lane width d_h.
        px_i = dot(x_cur, m_wxi[...]) + dot(ids, m_wii[...])         # [N, d_h]
        px_j = dot(x_cur, m_wxj[...]) + dot(ids, m_wij[...])         # [N, d_h]
        h = dot(gather_i, px_i) + dot(gather_j, px_j) + m_b1[...]    # [E, d_h]
        h = jnp.maximum(h, 0.0)
        msg = dot(h, m_w2[...]) + m_b2[...]                          # [E, d_msg]

        # Aggregate (add) per receiver node: scatter matrix == gather_i^T, so
        # contract the edge axis directly instead of building a second one-hot.
        aggr = lax.dot_general(gather_i, msg.astype(cdt),
                               (((0,), (0,)), ((), ())),
                               preferred_element_type=f32)           # [N, d_msg]

        # Update MLP (Linear -> ReLU -> Linear); outer model ReLU fused into the
        # last linear (bn disabled, so this is exact).
        h2 = dot(x_cur, u_wx[...]) + dot(aggr, u_wa[...]) + u_b1[...]
        h2 = jnp.maximum(h2, 0.0)
        x_cur = jnp.maximum(dot(h2, u_w2[...]) + u_b2[...], 0.0)

        y_nodes = y_nodes + dot(x_cur, jk_w_refs[l + 1][...])

    pred = dot(pool, y_nodes) + jk_b_ref[...]                        # [Gp, OUT_PAD]
    o_ref[...] = pred.astype(o_ref.dtype)


# ----------------------------- parameters ---------------------------------- #

def _init_linear(key, d_in, d_out):
    k1, k2 = jax.random.split(key)
    scale = 1.0 / jnp.sqrt(jnp.float32(d_in))
    W = jax.random.uniform(k1, (d_in, d_out), jnp.float32, -scale, scale)
    b = jax.random.uniform(k2, (d_out,), jnp.float32, -scale, scale)
    return W, b


def init_params(key, in_features, d_enc, d_id, d_msg, d_out, d_h, out_features):
    keys = iter(jax.random.split(key, 64))
    params = {}
    params["enc_W"], params["enc_b"] = _init_linear(next(keys), in_features, d_enc)

    layers = []
    d_in = d_enc
    jk_dims = [d_in]
    for i in range(len(d_out)):
        lp = {}
        d_edge = 2 * d_in + 2 * d_id                      # [x_i, x_j, id_i, id_j]
        lp["msg_W1"], lp["msg_b1"] = _init_linear(next(keys), d_edge, d_h[i])
        lp["msg_W2"], lp["msg_b2"] = _init_linear(next(keys), d_h[i], d_msg[i])
        d_upd = d_in + d_msg[i]                           # [x, aggr_msg]
        lp["upd_W1"], lp["upd_b1"] = _init_linear(next(keys), d_upd, d_h[i])
        lp["upd_W2"], lp["upd_b2"] = _init_linear(next(keys), d_h[i], d_out[i])
        layers.append(lp)
        d_in = d_out[i]
        jk_dims.append(d_in)
    params["layers"] = layers
    params["jk"] = [_init_linear(next(keys), d, out_features) for d in jk_dims]
    return params


# ----------------------------- forward pass -------------------------------- #

def gnn_forward(params, x, edge_index, identifiers, degrees, batch, *,
                num_graphs, use_bf16=True):
    # degree_encoder('None') is identity; degrees are unused by msg_kind='general'.
    del degrees
    cdt = jnp.bfloat16 if use_bf16 else jnp.float32
    row, col = edge_index[0], edge_index[1]   # flow='target_to_source': receiver = row
    N = x.shape[0]
    E = row.shape[0]
    num_layers = len(params["layers"])
    d_id = identifiers.shape[1]
    id_pad = max(8, ((d_id + 7) // 8) * 8)          # keep every matmul K-dim >= 8
    out_features = params["jk"][0][0].shape[1]
    out_pad = ((out_features + 127) // 128) * 128   # lane-dense output slab
    g_pad = max(8, ((num_graphs + 7) // 8) * 8)     # full (8,128) output tile

    # Index tensors in the orientations the kernel needs (avoids in-kernel
    # transposes: lane-broadcast vs. sublane-broadcast comparisons).
    row_e = row.astype(jnp.int32).reshape(E, 1)
    col_e = col.astype(jnp.int32).reshape(E, 1)
    batch_r = batch.astype(jnp.int32).reshape(1, N)

    ids_p = jnp.pad(identifiers.astype(jnp.float32),
                    ((0, 0), (0, id_pad - d_id))).astype(cdt)

    args = [x.astype(cdt), ids_p, row_e, col_e, batch_r,
            params["enc_W"].astype(cdt), params["enc_b"].reshape(1, -1)]

    d_in = params["enc_W"].shape[1]
    layer_dims = []
    for lp in params["layers"]:
        mW1 = lp["msg_W1"]
        uW1 = lp["upd_W1"]
        w_id_i = jnp.pad(mW1[2 * d_in:2 * d_in + d_id], ((0, id_pad - d_id), (0, 0)))
        w_id_j = jnp.pad(mW1[2 * d_in + d_id:2 * d_in + 2 * d_id],
                         ((0, id_pad - d_id), (0, 0)))
        args += [
            mW1[:d_in].astype(cdt), mW1[d_in:2 * d_in].astype(cdt),
            w_id_i.astype(cdt), w_id_j.astype(cdt),
            lp["msg_b1"].reshape(1, -1),
            lp["msg_W2"].astype(cdt), lp["msg_b2"].reshape(1, -1),
            uW1[:d_in].astype(cdt), uW1[d_in:].astype(cdt),
            lp["upd_b1"].reshape(1, -1),
            lp["upd_W2"].astype(cdt), lp["upd_b2"].reshape(1, -1),
        ]
        layer_dims.append((d_in, lp["msg_W2"].shape[0], lp["msg_W2"].shape[1],
                           lp["upd_W2"].shape[1]))
        d_in = lp["upd_W2"].shape[1]

    # JK heads: zero-pad output axis to the lane-dense width, sum the biases.
    # (Assumes every final_projection flag is True, per the declared config.)
    jk_b_sum = jnp.zeros((1, out_pad), jnp.float32)
    for (Wjk, bjk) in params["jk"]:
        args.append(jnp.pad(Wjk, ((0, 0), (0, out_pad - out_features))).astype(cdt))
        jk_b_sum = jk_b_sum.at[:, :out_features].add(bjk)
    args.append(jk_b_sum)

    # Advisory cost estimate + explicit scoped-VMEM budget (with headroom).
    d_enc = params["enc_W"].shape[1]
    flops = 2 * N * x.shape[1] * d_enc + 2 * N * d_enc * out_pad
    for (d_prev, dh, dmsg, dout_l) in layer_dims:
        flops += 2 * 2 * N * (d_prev + id_pad) * dh      # px_i, px_j
        flops += 2 * 2 * E * N * dh                      # two gather matmuls
        flops += 2 * E * dh * dmsg                       # msg W2
        flops += 2 * E * N * dmsg                        # scatter-add (gather_i^T)
        flops += 2 * N * (d_prev * dh + dmsg * dh + dh * dout_l)   # update MLP
        flops += 2 * N * dout_l * out_pad                # JK accumulation
    flops += 2 * g_pad * N * out_pad                     # pool matmul
    bytes_accessed = sum(int(a.size) * a.dtype.itemsize for a in args)
    bytes_accessed += g_pad * out_pad * 4
    cost = pl.CostEstimate(flops=int(flops), transcendentals=0,
                           bytes_accessed=int(bytes_accessed))
    vmem_limit = int(min(max(8 << 20, 6 * bytes_accessed), 32 << 20))

    vmem_spec = pl.BlockSpec(memory_space=pltpu.MemorySpace.VMEM)
    pred_pad = pl.pallas_call(
        functools.partial(_gnn_fused_kernel, num_layers=num_layers,
                          compute_dtype=cdt),
        out_shape=jax.ShapeDtypeStruct((g_pad, out_pad), jnp.float32),
        in_specs=[vmem_spec] * len(args),
        out_specs=vmem_spec,
        compiler_params=pltpu.CompilerParams(vmem_limit_bytes=vmem_limit),
        cost_estimate=cost,
    )(*args)
    # TODO(synk): dropout / BatchNorm1d omitted (eval mode, bn=[False,False] config).
    return pred_pad[:num_graphs, :out_features]


# ------------------------- pure-JAX reference ------------------------------ #

def ref_forward(params, x, edge_index, identifiers, degrees, batch, *, num_graphs):
    del degrees
    row, col = edge_index[0], edge_index[1]
    N = x.shape[0]
    x = x @ params["enc_W"] + params["enc_b"]
    ids = identifiers.astype(jnp.float32)
    x_interm = [x]
    for lp in params["layers"]:
        edge_in = jnp.concatenate([x[row], x[col], ids[row], ids[col]], -1)
        h = jax.nn.relu(edge_in @ lp["msg_W1"] + lp["msg_b1"])
        msg = h @ lp["msg_W2"] + lp["msg_b2"]
        aggr = jax.ops.segment_sum(msg, row, num_segments=N)
        upd_in = jnp.concatenate([x, aggr], -1)
        h = jax.nn.relu(upd_in @ lp["upd_W1"] + lp["upd_b1"])
        x = jax.nn.relu(h @ lp["upd_W2"] + lp["upd_b2"])
        x_interm.append(x)
    pred = jnp.zeros((num_graphs, params["jk"][0][0].shape[1]), jnp.float32)
    for xi_, (Wjk, bjk) in zip(x_interm, params["jk"]):
        xg = jax.ops.segment_sum(xi_, batch, num_segments=num_graphs)
        pred = pred + (xg @ Wjk + bjk)
    return pred


# --------------------------------- main ------------------------------------ #

if __name__ == "__main__":
    key = jax.random.PRNGKey(0)
    k_param, k_x, k_id = jax.random.split(key, 3)

    # Four ring graphs of 8 nodes each -> 32 nodes, 64 directed edges.
    in_features = 8
    d_enc = 16
    d_id = 2
    d_msg = [32, 32]
    d_out = [32, 32]
    d_h = [32, 32]
    out_features = 4
    num_graphs = 4
    n_per_graph = 8
    N = num_graphs * n_per_graph

    rows, cols = [], []
    for g in range(num_graphs):
        off = g * n_per_graph
        src = jnp.arange(n_per_graph) + off
        dst = (jnp.arange(n_per_graph) + 1) % n_per_graph + off
        rows.append(jnp.concatenate([src, dst]))
        cols.append(jnp.concatenate([dst, src]))
    edge_index = jnp.stack([jnp.concatenate(rows), jnp.concatenate(cols)]).astype(jnp.int32)

    x = jax.random.normal(k_x, (N, in_features), jnp.float32)
    identifiers = jax.random.randint(k_id, (N, d_id), 0, 4).astype(jnp.float32)
    degrees = jnp.full((N, 1), 2.0, jnp.float32)
    batch = jnp.repeat(jnp.arange(num_graphs, dtype=jnp.int32), n_per_graph)

    params = init_params(k_param, in_features, d_enc, d_id, d_msg, d_out, d_h,
                         out_features)

    fwd_f32 = jax.jit(functools.partial(gnn_forward, num_graphs=num_graphs,
                                        use_bf16=False))
    fwd_bf16 = jax.jit(functools.partial(gnn_forward, num_graphs=num_graphs,
                                         use_bf16=True))
    pred_f32 = jax.block_until_ready(
        fwd_f32(params, x, edge_index, identifiers, degrees, batch))
    pred_bf16 = jax.block_until_ready(
        fwd_bf16(params, x, edge_index, identifiers, degrees, batch))

    ref = ref_forward(params, x, edge_index, identifiers, degrees, batch,
                      num_graphs=num_graphs)
    assert pred_f32.shape == (num_graphs, out_features)
    assert pred_bf16.shape == (num_graphs, out_features)
    # Exact (f32) path: tight tolerance against the pure-JAX reference.
    assert jnp.allclose(pred_f32, ref, atol=2e-3, rtol=2e-3), (pred_f32, ref)
    # bf16-MXU path: tolerance scaled to bf16 rounding of the activations.
    err = float(jnp.max(jnp.abs(pred_bf16 - ref)))
    tol = 0.05 * float(jnp.max(jnp.abs(ref))) + 0.05
    assert err <= tol, (err, tol, pred_bf16, ref)
    print("KERNEL_OK")
</pallas_src>

<mosaic_0001>
module attributes {stable_mosaic.version = 11 : i64} {
  func.func @_gnn_fused_kernel(%arg0: memref<32x8xf32, #tpu.memory_space<vmem>>, %arg1: memref<32x8xf32, #tpu.memory_space<vmem>>, %arg2: memref<64x1xi32, #tpu.memory_space<vmem>>, %arg3: memref<64x1xi32, #tpu.memory_space<vmem>>, %arg4: memref<1x32xi32, #tpu.memory_space<vmem>>, %arg5: memref<8x16xf32, #tpu.memory_space<vmem>>, %arg6: memref<1x16xf32, #tpu.memory_space<vmem>>, %arg7: memref<16x32xf32, #tpu.memory_space<vmem>>, %arg8: memref<16x32xf32, #tpu.memory_space<vmem>>, %arg9: memref<8x32xf32, #tpu.memory_space<vmem>>, %arg10: memref<8x32xf32, #tpu.memory_space<vmem>>, %arg11: memref<1x32xf32, #tpu.memory_space<vmem>>, %arg12: memref<32x32xf32, #tpu.memory_space<vmem>>, %arg13: memref<1x32xf32, #tpu.memory_space<vmem>>, %arg14: memref<16x32xf32, #tpu.memory_space<vmem>>, %arg15: memref<32x32xf32, #tpu.memory_space<vmem>>, %arg16: memref<1x32xf32, #tpu.memory_space<vmem>>, %arg17: memref<32x32xf32, #tpu.memory_space<vmem>>, %arg18: memref<1x32xf32, #tpu.memory_space<vmem>>, %arg19: memref<32x32xf32, #tpu.memory_space<vmem>>, %arg20: memref<32x32xf32, #tpu.memory_space<vmem>>, %arg21: memref<8x32xf32, #tpu.memory_space<vmem>>, %arg22: memref<8x32xf32, #tpu.memory_space<vmem>>, %arg23: memref<1x32xf32, #tpu.memory_space<vmem>>, %arg24: memref<32x32xf32, #tpu.memory_space<vmem>>, %arg25: memref<1x32xf32, #tpu.memory_space<vmem>>, %arg26: memref<32x32xf32, #tpu.memory_space<vmem>>, %arg27: memref<32x32xf32, #tpu.memory_space<vmem>>, %arg28: memref<1x32xf32, #tpu.memory_space<vmem>>, %arg29: memref<32x32xf32, #tpu.memory_space<vmem>>, %arg30: memref<1x32xf32, #tpu.memory_space<vmem>>, %arg31: memref<16x128xf32, #tpu.memory_space<vmem>>, %arg32: memref<32x128xf32, #tpu.memory_space<vmem>>, %arg33: memref<32x128xf32, #tpu.memory_space<vmem>>, %arg34: memref<1x128xf32, #tpu.memory_space<vmem>>, %arg35: memref<8x128xf32, #tpu.memory_space<vmem>>) attributes {dimension_semantics = [], scalar_prefetch = 0 : i64, scratch_operands = 0 : i64, tpu.core_type = #tpu.core_type<tc>} {
    %0 = tpu.iota {dimensions = array<i32: 1>} : vector<64x32xi32>
    %c0 = arith.constant 0 : index
    %c0_0 = arith.constant 0 : index
    %1 = vector.load %arg2[%c0, %c0_0] : memref<64x1xi32, #tpu.memory_space<vmem>>, vector<64x1xi32>
    %2 = vector.broadcast %1 : vector<64x1xi32> to vector<64x32xi32>
    %3 = arith.cmpi eq, %0, %2 : vector<64x32xi32>
    %cst = arith.constant 1.000000e+00 : f32
    %cst_1 = arith.constant 0.000000e+00 : f32
    %4 = vector.broadcast %cst : f32 to vector<64x32xf32>
    %5 = vector.broadcast %cst_1 : f32 to vector<64x32xf32>
    %6 = arith.select %3, %4, %5 : vector<64x32xi1>, vector<64x32xf32>
    %c0_2 = arith.constant 0 : index
    %c0_3 = arith.constant 0 : index
    %7 = vector.load %arg3[%c0_2, %c0_3] : memref<64x1xi32, #tpu.memory_space<vmem>>, vector<64x1xi32>
    %8 = vector.broadcast %7 : vector<64x1xi32> to vector<64x32xi32>
    %9 = arith.cmpi eq, %0, %8 : vector<64x32xi32>
    %cst_4 = arith.constant 1.000000e+00 : f32
    %cst_5 = arith.constant 0.000000e+00 : f32
    %10 = vector.broadcast %cst_4 : f32 to vector<64x32xf32>
    %11 = vector.broadcast %cst_5 : f32 to vector<64x32xf32>
    %12 = arith.select %9, %10, %11 : vector<64x32xi1>, vector<64x32xf32>
    %13 = tpu.iota {dimensions = array<i32: 0>} : vector<8x32xi32>
    %c0_6 = arith.constant 0 : index
    %c0_7 = arith.constant 0 : index
    %14 = vector.load %arg4[%c0_6, %c0_7] : memref<1x32xi32, #tpu.memory_space<vmem>>, vector<1x32xi32>
    %15 = vector.broadcast %14 : vector<1x32xi32> to vector<8x32xi32>
    %16 = arith.cmpi eq, %13, %15 : vector<8x32xi32>
    %cst_8 = arith.constant 1.000000e+00 : f32
    %cst_9 = arith.constant 0.000000e+00 : f32
    %17 = vector.broadcast %cst_8 : f32 to vector<8x32xf32>
    %18 = vector.broadcast %cst_9 : f32 to vector<8x32xf32>
    %19 = arith.select %16, %17, %18 : vector<8x32xi1>, vector<8x32xf32>
    %c0_10 = arith.constant 0 : index
    %c0_11 = arith.constant 0 : index
    %20 = vector.load %arg1[%c0_10, %c0_11] : memref<32x8xf32, #tpu.memory_space<vmem>>, vector<32x8xf32>
    %c0_12 = arith.constant 0 : index
    %c0_13 = arith.constant 0 : index
    %21 = vector.load %arg0[%c0_12, %c0_13] : memref<32x8xf32, #tpu.memory_space<vmem>>, vector<32x8xf32>
    %c0_14 = arith.constant 0 : index
    %c0_15 = arith.constant 0 : index
    %22 = vector.load %arg5[%c0_14, %c0_15] : memref<8x16xf32, #tpu.memory_space<vmem>>, vector<8x16xf32>
    %cst_16 = arith.constant dense<0.000000e+00> : vector<32x16xf32>
    %23 = tpu.matmul %21, %22, %cst_16 {dimension_numbers = #tpu.dot_dimension_numbers<[1], [0], [0], [1], [0, 0, 1, 1], [], []>} : vector<32x8xf32>, vector<8x16xf32>, vector<32x16xf32> -> vector<32x16xf32>
    %c0_17 = arith.constant 0 : index
    %c0_18 = arith.constant 0 : index
    %24 = vector.load %arg6[%c0_17, %c0_18] : memref<1x16xf32, #tpu.memory_space<vmem>>, vector<1x16xf32>
    %25 = vector.broadcast %24 : vector<1x16xf32> to vector<32x16xf32>
    %26 = arith.addf %23, %25 : vector<32x16xf32>
    %c0_19 = arith.constant 0 : index
    %c0_20 = arith.constant 0 : index
    %27 = vector.load %arg31[%c0_19, %c0_20] : memref<16x128xf32, #tpu.memory_space<vmem>>, vector<16x128xf32>
    %cst_21 = arith.constant dense<0.000000e+00> : vector<32x128xf32>
    %28 = tpu.matmul %26, %27, %cst_21 {dimension_numbers = #tpu.dot_dimension_numbers<[1], [0], [0], [1], [0, 0, 1, 1], [], []>} : vector<32x16xf32>, vector<16x128xf32>, vector<32x128xf32> -> vector<32x128xf32>
    %c0_22 = arith.constant 0 : index
    %c0_23 = arith.constant 0 : index
    %29 = vector.load %arg7[%c0_22, %c0_23] : memref<16x32xf32, #tpu.memory_space<vmem>>, vector<16x32xf32>
    %cst_24 = arith.constant dense<0.000000e+00> : vector<32x32xf32>
    %30 = tpu.matmul %26, %29, %cst_24 {dimension_numbers = #tpu.dot_dimension_numbers<[1], [0], [0], [1], [0, 0, 1, 1], [], []>} : vector<32x16xf32>, vector<16x32xf32>, vector<32x32xf32> -> vector<32x32xf32>
    %c0_25 = arith.constant 0 : index
    %c0_26 = arith.constant 0 : index
    %31 = vector.load %arg9[%c0_25, %c0_26] : memref<8x32xf32, #tpu.memory_space<vmem>>, vector<8x32xf32>
    %cst_27 = arith.constant dense<0.000000e+00> : vector<32x32xf32>
    %32 = tpu.matmul %20, %31, %cst_27 {dimension_numbers = #tpu.dot_dimension_numbers<[1], [0], [0], [1], [0, 0, 1, 1], [], []>} : vector<32x8xf32>, vector<8x32xf32>, vector<32x32xf32> -> vector<32x32xf32>
    %33 = arith.addf %30, %32 : vector<32x32xf32>
    %c0_28 = arith.constant 0 : index
    %c0_29 = arith.constant 0 : index
    %34 = vector.load %arg8[%c0_28, %c0_29] : memref<16x32xf32, #tpu.memory_space<vmem>>, vector<16x32xf32>
    %cst_30 = arith.constant dense<0.000000e+00> : vector<32x32xf32>
    %35 = tpu.matmul %26, %34, %cst_30 {dimension_numbers = #tpu.dot_dimension_numbers<[1], [0], [0], [1], [0, 0, 1, 1], [], []>} : vector<32x16xf32>, vector<16x32xf32>, vector<32x32xf32> -> vector<32x32xf32>
    %c0_31 = arith.constant 0 : index
    %c0_32 = arith.constant 0 : index
    %36 = vector.load %arg10[%c0_31, %c0_32] : memref<8x32xf32, #tpu.memory_space<vmem>>, vector<8x32xf32>
    %cst_33 = arith.constant dense<0.000000e+00> : vector<32x32xf32>
    %37 = tpu.matmul %20, %36, %cst_33 {dimension_numbers = #tpu.dot_dimension_numbers<[1], [0], [0], [1], [0, 0, 1, 1], [], []>} : vector<32x8xf32>, vector<8x32xf32>, vector<32x32xf32> -> vector<32x32xf32>
    %38 = arith.addf %35, %37 : vector<32x32xf32>
    %cst_34 = arith.constant dense<0.000000e+00> : vector<64x32xf32>
    %39 = tpu.matmul %6, %33, %cst_34 {dimension_numbers = #tpu.dot_dimension_numbers<[1], [0], [0], [1], [0, 0, 1, 1], [], []>} : vector<64x32xf32>, vector<32x32xf32>, vector<64x32xf32> -> vector<64x32xf32>
    %cst_35 = arith.constant dense<0.000000e+00> : vector<64x32xf32>
    %40 = tpu.matmul %12, %38, %cst_35 {dimension_numbers = #tpu.dot_dimension_numbers<[1], [0], [0], [1], [0, 0, 1, 1], [], []>} : vector<64x32xf32>, vector<32x32xf32>, vector<64x32xf32> -> vector<64x32xf32>
    %41 = arith.addf %39, %40 : vector<64x32xf32>
    %c0_36 = arith.constant 0 : index
    %c0_37 = arith.constant 0 : index
    %42 = vector.load %arg11[%c0_36, %c0_37] : memref<1x32xf32, #tpu.memory_space<vmem>>, vector<1x32xf32>
    %43 = vector.broadcast %42 : vector<1x32xf32> to vector<64x32xf32>
    %44 = arith.addf %41, %43 : vector<64x32xf32>
    %cst_38 = arith.constant 0.000000e+00 : f32
    %45 = vector.broadcast %cst_38 : f32 to vector<64x32xf32>
    %46 = arith.maximumf %44, %45 : vector<64x32xf32>
    %c0_39 = arith.constant 0 : index
    %c0_40 = arith.constant 0 : index
    %47 = vector.load %arg12[%c0_39, %c0_40] : memref<32x32xf32, #tpu.memory_space<vmem>>, vector<32x32xf32>
    %cst_41 = arith.constant dense<0.000000e+00> : vector<64x32xf32>
    %48 = tpu.matmul %46, %47, %cst_41 {dimension_numbers = #tpu.dot_dimension_numbers<[1], [0], [0], [1], [0, 0, 1, 1], [], []>} : vector<64x32xf32>, vector<32x32xf32>, vector<64x32xf32> -> vector<64x32xf32>
    %c0_42 = arith.constant 0 : index
    %c0_43 = arith.constant 0 : index
    %49 = vector.load %arg13[%c0_42, %c0_43] : memref<1x32xf32, #tpu.memory_space<vmem>>, vector<1x32xf32>
    %50 = vector.broadcast %49 : vector<1x32xf32> to vector<64x32xf32>
    %51 = arith.addf %48, %50 : vector<64x32xf32>
    %cst_44 = arith.constant dense<0.000000e+00> : vector<32x32xf32>
    %52 = tpu.matmul %6, %51, %cst_44 {dimension_numbers = #tpu.dot_dimension_numbers<[0], [0], [1], [1], [0, 1, 1, 1], [], []>} : vector<64x32xf32>, vector<64x32xf32>, vector<32x32xf32> -> vector<32x32xf32>
    %c0_45 = arith.constant 0 : index
    %c0_46 = arith.constant 0 : index
    %53 = vector.load %arg14[%c0_45, %c0_46] : memref<16x32xf32, #tpu.memory_space<vmem>>, vector<16x32xf32>
    %cst_47 = arith.constant dense<0.000000e+00> : vector<32x32xf32>
    %54 = tpu.matmul %26, %53, %cst_47 {dimension_numbers = #tpu.dot_dimension_numbers<[1], [0], [0], [1], [0, 0, 1, 1], [], []>} : vector<32x16xf32>, vector<16x32xf32>, vector<32x32xf32> -> vector<32x32xf32>
    %c0_48 = arith.constant 0 : index
    %c0_49 = arith.constant 0 : index
    %55 = vector.load %arg15[%c0_48, %c0_49] : memref<32x32xf32, #tpu.memory_space<vmem>>, vector<32x32xf32>
    %cst_50 = arith.constant dense<0.000000e+00> : vector<32x32xf32>
    %56 = tpu.matmul %52, %55, %cst_50 {dimension_numbers = #tpu.dot_dimension_numbers<[1], [0], [0], [1], [0, 0, 1, 1], [], []>} : vector<32x32xf32>, vector<32x32xf32>, vector<32x32xf32> -> vector<32x32xf32>
    %57 = arith.addf %54, %56 : vector<32x32xf32>
    %c0_51 = arith.constant 0 : index
    %c0_52 = arith.constant 0 : index
    %58 = vector.load %arg16[%c0_51, %c0_52] : memref<1x32xf32, #tpu.memory_space<vmem>>, vector<1x32xf32>
    %59 = vector.broadcast %58 : vector<1x32xf32> to vector<32x32xf32>
    %60 = arith.addf %57, %59 : vector<32x32xf32>
    %cst_53 = arith.constant 0.000000e+00 : f32
    %61 = vector.broadcast %cst_53 : f32 to vector<32x32xf32>
    %62 = arith.maximumf %60, %61 : vector<32x32xf32>
    %c0_54 = arith.constant 0 : index
    %c0_55 = arith.constant 0 : index
    %63 = vector.load %arg17[%c0_54, %c0_55] : memref<32x32xf32, #tpu.memory_space<vmem>>, vector<32x32xf32>
    %cst_56 = arith.constant dense<0.000000e+00> : vector<32x32xf32>
    %64 = tpu.matmul %62, %63, %cst_56 {dimension_numbers = #tpu.dot_dimension_numbers<[1], [0], [0], [1], [0, 0, 1, 1], [], []>} : vector<32x32xf32>, vector<32x32xf32>, vector<32x32xf32> -> vector<32x32xf32>
    %c0_57 = arith.constant 0 : index
    %c0_58 = arith.constant 0 : index
    %65 = vector.load %arg18[%c0_57, %c0_58] : memref<1x32xf32, #tpu.memory_space<vmem>>, vector<1x32xf32>
    %66 = vector.broadcast %65 : vector<1x32xf32> to vector<32x32xf32>
    %67 = arith.addf %64, %66 : vector<32x32xf32>
    %cst_59 = arith.constant 0.000000e+00 : f32
    %68 = vector.broadcast %cst_59 : f32 to vector<32x32xf32>
    %69 = arith.maximumf %67, %68 : vector<32x32xf32>
    %c0_60 = arith.constant 0 : index
    %c0_61 = arith.constant 0 : index
    %70 = vector.load %arg32[%c0_60, %c0_61] : memref<32x128xf32, #tpu.memory_space<vmem>>, vector<32x128xf32>
    %cst_62 = arith.constant dense<0.000000e+00> : vector<32x128xf32>
    %71 = tpu.matmul %69, %70, %cst_62 {dimension_numbers = #tpu.dot_dimension_numbers<[1], [0], [0], [1], [0, 0, 1, 1], [], []>} : vector<32x32xf32>, vector<32x128xf32>, vector<32x128xf32> -> vector<32x128xf32>
    %72 = arith.addf %28, %71 : vector<32x128xf32>
    %c0_63 = arith.constant 0 : index
    %c0_64 = arith.constant 0 : index
    %73 = vector.load %arg19[%c0_63, %c0_64] : memref<32x32xf32, #tpu.memory_space<vmem>>, vector<32x32xf32>
    %cst_65 = arith.constant dense<0.000000e+00> : vector<32x32xf32>
    %74 = tpu.matmul %69, %73, %cst_65 {dimension_numbers = #tpu.dot_dimension_numbers<[1], [0], [0], [1], [0, 0, 1, 1], [], []>} : vector<32x32xf32>, vector<32x32xf32>, vector<32x32xf32> -> vector<32x32xf32>
    %c0_66 = arith.constant 0 : index
    %c0_67 = arith.constant 0 : index
    %75 = vector.load %arg21[%c0_66, %c0_67] : memref<8x32xf32, #tpu.memory_space<vmem>>, vector<8x32xf32>
    %cst_68 = arith.constant dense<0.000000e+00> : vector<32x32xf32>
    %76 = tpu.matmul %20, %75, %cst_68 {dimension_numbers = #tpu.dot_dimension_numbers<[1], [0], [0], [1], [0, 0, 1, 1], [], []>} : vector<32x8xf32>, vector<8x32xf32>, vector<32x32xf32> -> vector<32x32xf32>
    %77 = arith.addf %74, %76 : vector<32x32xf32>
    %c0_69 = arith.constant 0 : index
    %c0_70 = arith.constant 0 : index
    %78 = vector.load %arg20[%c0_69, %c0_70] : memref<32x32xf32, #tpu.memory_space<vmem>>, vector<32x32xf32>
    %cst_71 = arith.constant dense<0.000000e+00> : vector<32x32xf32>
    %79 = tpu.matmul %69, %78, %cst_71 {dimension_numbers = #tpu.dot_dimension_numbers<[1], [0], [0], [1], [0, 0, 1, 1], [], []>} : vector<32x32xf32>, vector<32x32xf32>, vector<32x32xf32> -> vector<32x32xf32>
    %c0_72 = arith.constant 0 : index
    %c0_73 = arith.constant 0 : index
    %80 = vector.load %arg22[%c0_72, %c0_73] : memref<8x32xf32, #tpu.memory_space<vmem>>, vector<8x32xf32>
    %cst_74 = arith.constant dense<0.000000e+00> : vector<32x32xf32>
    %81 = tpu.matmul %20, %80, %cst_74 {dimension_numbers = #tpu.dot_dimension_numbers<[1], [0], [0], [1], [0, 0, 1, 1], [], []>} : vector<32x8xf32>, vector<8x32xf32>, vector<32x32xf32> -> vector<32x32xf32>
    %82 = arith.addf %79, %81 : vector<32x32xf32>
    %cst_75 = arith.constant dense<0.000000e+00> : vector<64x32xf32>
    %83 = tpu.matmul %6, %77, %cst_75 {dimension_numbers = #tpu.dot_dimension_numbers<[1], [0], [0], [1], [0, 0, 1, 1], [], []>} : vector<64x32xf32>, vector<32x32xf32>, vector<64x32xf32> -> vector<64x32xf32>
    %cst_76 = arith.constant dense<0.000000e+00> : vector<64x32xf32>
    %84 = tpu.matmul %12, %82, %cst_76 {dimension_numbers = #tpu.dot_dimension_numbers<[1], [0], [0], [1], [0, 0, 1, 1], [], []>} : vector<64x32xf32>, vector<32x32xf32>, vector<64x32xf32> -> vector<64x32xf32>
    %85 = arith.addf %83, %84 : vector<64x32xf32>
    %c0_77 = arith.constant 0 : index
    %c0_78 = arith.constant 0 : index
    %86 = vector.load %arg23[%c0_77, %c0_78] : memref<1x32xf32, #tpu.memory_space<vmem>>, vector<1x32xf32>
    %87 = vector.broadcast %86 : vector<1x32xf32> to vector<64x32xf32>
    %88 = arith.addf %85, %87 : vector<64x32xf32>
    %cst_79 = arith.constant 0.000000e+00 : f32
    %89 = vector.broadcast %cst_79 : f32 to vector<64x32xf32>
    %90 = arith.maximumf %88, %89 : vector<64x32xf32>
    %c0_80 = arith.constant 0 : index
    %c0_81 = arith.constant 0 : index
    %91 = vector.load %arg24[%c0_80, %c0_81] : memref<32x32xf32, #tpu.memory_space<vmem>>, vector<32x32xf32>
    %cst_82 = arith.constant dense<0.000000e+00> : vector<64x32xf32>
    %92 = tpu.matmul %90, %91, %cst_82 {dimension_numbers = #tpu.dot_dimension_numbers<[1], [0], [0], [1], [0, 0, 1, 1], [], []>} : vector<64x32xf32>, vector<32x32xf32>, vector<64x32xf32> -> vector<64x32xf32>
    %c0_83 = arith.constant 0 : index
    %c0_84 = arith.constant 0 : index
    %93 = vector.load %arg25[%c0_83, %c0_84] : memref<1x32xf32, #tpu.memory_space<vmem>>, vector<1x32xf32>
    %94 = vector.broadcast %93 : vector<1x32xf32> to vector<64x32xf32>
    %95 = arith.addf %92, %94 : vector<64x32xf32>
    %cst_85 = arith.constant dense<0.000000e+00> : vector<32x32xf32>
    %96 = tpu.matmul %6, %95, %cst_85 {dimension_numbers = #tpu.dot_dimension_numbers<[0], [0], [1], [1], [0, 1, 1, 1], [], []>} : vector<64x32xf32>, vector<64x32xf32>, vector<32x32xf32> -> vector<32x32xf32>
    %c0_86 = arith.constant 0 : index
    %c0_87 = arith.constant 0 : index
    %97 = vector.load %arg26[%c0_86, %c0_87] : memref<32x32xf32, #tpu.memory_space<vmem>>, vector<32x32xf32>
    %cst_88 = arith.constant dense<0.000000e+00> : vector<32x32xf32>
    %98 = tpu.matmul %69, %97, %cst_88 {dimension_numbers = #tpu.dot_dimension_numbers<[1], [0], [0], [1], [0, 0, 1, 1], [], []>} : vector<32x32xf32>, vector<32x32xf32>, vector<32x32xf32> -> vector<32x32xf32>
    %c0_89 = arith.constant 0 : index
    %c0_90 = arith.constant 0 : index
    %99 = vector.load %arg27[%c0_89, %c0_90] : memref<32x32xf32, #tpu.memory_space<vmem>>, vector<32x32xf32>
    %cst_91 = arith.constant dense<0.000000e+00> : vector<32x32xf32>
    %100 = tpu.matmul %96, %99, %cst_91 {dimension_numbers = #tpu.dot_dimension_numbers<[1], [0], [0], [1], [0, 0, 1, 1], [], []>} : vector<32x32xf32>, vector<32x32xf32>, vector<32x32xf32> -> vector<32x32xf32>
    %101 = arith.addf %98, %100 : vector<32x32xf32>
    %c0_92 = arith.constant 0 : index
    %c0_93 = arith.constant 0 : index
    %102 = vector.load %arg28[%c0_92, %c0_93] : memref<1x32xf32, #tpu.memory_space<vmem>>, vector<1x32xf32>
    %103 = vector.broadcast %102 : vector<1x32xf32> to vector<32x32xf32>
    %104 = arith.addf %101, %103 : vector<32x32xf32>
    %cst_94 = arith.constant 0.000000e+00 : f32
    %105 = vector.broadcast %cst_94 : f32 to vector<32x32xf32>
    %106 = arith.maximumf %104, %105 : vector<32x32xf32>
    %c0_95 = arith.constant 0 : index
    %c0_96 = arith.constant 0 : index
    %107 = vector.load %arg29[%c0_95, %c0_96] : memref<32x32xf32, #tpu.memory_space<vmem>>, vector<32x32xf32>
    %cst_97 = arith.constant dense<0.000000e+00> : vector<32x32xf32>
    %108 = tpu.matmul %106, %107, %cst_97 {dimension_numbers = #tpu.dot_dimension_numbers<[1], [0], [0], [1], [0, 0, 1, 1], [], []>} : vector<32x32xf32>, vector<32x32xf32>, vector<32x32xf32> -> vector<32x32xf32>
    %c0_98 = arith.constant 0 : index
    %c0_99 = arith.constant 0 : index
    %109 = vector.load %arg30[%c0_98, %c0_99] : memref<1x32xf32, #tpu.memory_space<vmem>>, vector<1x32xf32>
    %110 = vector.broadcast %109 : vector<1x32xf32> to vector<32x32xf32>
    %111 = arith.addf %108, %110 : vector<32x32xf32>
    %cst_100 = arith.constant 0.000000e+00 : f32
    %112 = vector.broadcast %cst_100 : f32 to vector<32x32xf32>
    %113 = arith.maximumf %111, %112 : vector<32x32xf32>
    %c0_101 = arith.constant 0 : index
    %c0_102 = arith.constant 0 : index
    %114 = vector.load %arg33[%c0_101, %c0_102] : memref<32x128xf32, #tpu.memory_space<vmem>>, vector<32x128xf32>
    %cst_103 = arith.constant dense<0.000000e+00> : vector<32x128xf32>
    %115 = tpu.matmul %113, %114, %cst_103 {dimension_numbers = #tpu.dot_dimension_numbers<[1], [0], [0], [1], [0, 0, 1, 1], [], []>} : vector<32x32xf32>, vector<32x128xf32>, vector<32x128xf32> -> vector<32x128xf32>
    %116 = arith.addf %72, %115 : vector<32x128xf32>
    %cst_104 = arith.constant dense<0.000000e+00> : vector<8x128xf32>
    %117 = tpu.matmul %19, %116, %cst_104 {dimension_numbers = #tpu.dot_dimension_numbers<[1], [0], [0], [1], [0, 0, 1, 1], [], []>} : vector<8x32xf32>, vector<32x128xf32>, vector<8x128xf32> -> vector<8x128xf32>
    %c0_105 = arith.constant 0 : index
    %c0_106 = arith.constant 0 : index
    %118 = vector.load %arg34[%c0_105, %c0_106] : memref<1x128xf32, #tpu.memory_space<vmem>>, vector<1x128xf32>
    %119 = vector.broadcast %118 : vector<1x128xf32> to vector<8x128xf32>
    %120 = arith.addf %117, %119 : vector<8x128xf32>
    %c0_107 = arith.constant 0 : index
    %c0_108 = arith.constant 0 : index
    %121 = vector.load %arg35[%c0_107, %c0_108] : memref<8x128xf32, #tpu.memory_space<vmem>>, vector<8x128xf32>
    tpu.vector_store %arg35[%c0_107, %c0_108], %120 {strides = array<i32>} : memref<8x128xf32, #tpu.memory_space<vmem>>, vector<8x128xf32>,
    return
  }
}

</mosaic_0001>

<bundles_post_ra>
// kernel: gnn_forward.1
= control target key start
LH: loop header
LB: loop body
LE: loop exit
PB: predicated region body
PF: predicated region fallthrough
CT: control target
= control target key end

     0   :  { %s3926_s3 = smov 5   ;;  %s3927_s10 = smov 7   ;;  %vm269_vm0 = vcmask 64512   ;;  %v3932_v14 = vmov 0   ;;  %vm469_vm1 = vcmask 130048   ;;  %v146_v41 = vlaneseq  ;;  %s4455_s0 = inlined_call_operand.smem [shape: u32[36], index: -1, kind: input, shape index: {}] }
   0x1   :  { %s3112_s6 = sld [smem:[%s4455_s0 + %s3926_s3]]   ;;  %s3928_s14 = smov 9   ;;  %3925 = vset.pattern.permute.xlu1 %v3932_v14  ;;  %3924 = vset.pattern.permute.xlu0 %v3932_v14  ;;  %v3936_v45 = vmov 0.0   ;;  %vm740_vm11 = vcmask 261120  }
   0x2   :  { %s1_s9 = sld [smem:[%s4455_s0]]   ;;  %s3929_s18 = smov 1   ;;  %v4066_v42 = vand.u32 127, %v146_v41 }
   0x3   :  { %s3114_s13 = sld [smem:[%s4455_s0 + %s3927_s10]]   ;;  %s3930_s22 = smov 10  }
   0x4   :  { %s3116_s17 = sld [smem:[%s4455_s0 + %s3928_s14]]   ;;  %s3931_s26 = smov 8  }
   0x5   :  { %s3108_s21 = sld [smem:[%s4455_s0 + %s3929_s18]]   ;;  %s3933_s30 = smov 2  }
   0x6   :  { %s3117_s25 = sld [smem:[%s4455_s0 + %s3930_s22]]   ;;  %s3934_s4 = smov 3  }
   0x7   :  { %v261_v0 = vld [vmem:[%s3112_s6] sm:$0xff]  ;;  %s4002_s29 = sld [smem:[%s4455_s0 + %s3931_s26]]   ;;  %s3935_s8 = smov 6  }
   0x8   :  { %3505 = vmatprep.subr.mxu0 %v261_v0  ;;  %v257_v1 = vld [vmem:[%s1_s9] sm:$0xff]  ;;  %v258_v2 = vld [vmem:[%s1_s9 + $0x8] sm:$0xff]  ;;  %v259_v3 = vld [vmem:[%s1_s9 + $0x10] sm:$0xff]  ;;  %s4024_s3 = sld [smem:[%s4455_s0 + %s3933_s30]]   ;;  %s3937_s12 = smov 12  }
   0x9   :  { %3506 = vmatpush3.msra.mxu0 %v261_v0  ;;  %3507 = vmatprep.mubr.msk.f32.mxu0 %vm269_vm0, %v257_v1  ;;  %v370_v4 = vld [vmem:[%s3114_s13 + $0x8] sm:$0xff]  ;;  %v260_v5 = vld [vmem:[%s1_s9 + $0x18] sm:$0xff]  ;;  %v369_v8 = vld [vmem:[%s3114_s13] sm:$0xff]  ;;  %s3110_s7 = sld [smem:[%s4455_s0 + %s3934_s4]]   ;;  %s3938_s16 = smov 14  }
   0xa   :  { %3508 = vmatmul.mubr.msk.f32.vlgmr.msra.gmra.mxu0 %vm269_vm0, %v258_v2  ;;  %3521 = vmatprep.subr.mxu0 %v370_v4  ;;  %v371_v6 = vld [vmem:[%s3116_s17] sm:$0xff]  ;;  %s3113_s11 = sld [smem:[%s4455_s0 + %s3935_s8]]   ;;  %s3939_s20 = smov 11  }
   0xb   :  { %3510 = vmatprep.mubr.msk.f32.mxu0 %vm269_vm0, %v259_v3  ;;  %3522 = vmatpush3.msra.mxu0 %v370_v4  ;;  %v3988_v7 = vld [vmem:[%s3108_s21] sm:$0xff]  ;;  %v3992_v9 = vld [vmem:[%s3108_s21 + $0x8] sm:$0xff]  ;;  %v4004_v10 = vld [vmem:[%s3108_s21 + $0x10] sm:$0xff]  ;;  %s3119_s15 = sld [smem:[%s4455_s0 + %s3937_s12]]   ;;  %s3940_s24 = smov 13  }
   0xc   :  { %3513 = vmatprep.subr.mxu1 %v371_v6  ;;  %3515 = vmatprep.mubr.msk.f32.mxu1 %vm269_vm0, %v3988_v7  ;;  %v4008_v11 = vld [vmem:[%s3108_s21 + $0x18] sm:$0xff]  ;;  %v569_v12 = vld [vmem:[%s3117_s25] sm:$0xff]  ;;  %s3121_s19 = sld [smem:[%s4455_s0 + %s3938_s16]]   ;;  %s3941_s28 = smov 15  }
   0xd   :  { %3514 = vmatpush3.msra.mxu1 %v371_v6  ;;  %3523 = vmatprep.subr.mxu0 %v369_v8  ;;  %v568_v13 = vld [vmem:[%s4002_s29 + $0x8] sm:$0xff]  ;;  %v567_v37 = vld [vmem:[%s4002_s29] sm:$0xff]  ;;  %s3118_s23 = sld [smem:[%s4455_s0 + %s3939_s20]]   ;;  %s3942_s2 = smov 17  }
   0xe   :  { %3511 = vmatmul.mubr.msk.f32.gmra.mxu0 %vm269_vm0, %v260_v5  ;;  %3516 = vmatmul.mubr.msk.f32.vlgmr.msra.gmra.mxu1 %vm269_vm0, %v3992_v9  ;;  %v149_v15 = vld [vmem:[%s4024_s3 + $0x8] sm:$0xff]  ;;  %v148_v16 = vld [vmem:[%s4024_s3] sm:$0xff]  ;;  %v150_v20 = vld [vmem:[%s4024_s3 + $0x10] sm:$0xff]  ;;  %s3120_s27 = sld [smem:[%s4455_s0 + %s3940_s24]]   ;;  %s3943_s6 = smov 31  }
   0xf   :  { %3524 = vmatpush3.msra.mxu0 %v369_v8  ;;  %3518 = vmatprep.mubr.msk.f32.mxu1 %vm269_vm0, %v4004_v10  ;;  %v197_v17 = vld [vmem:[%s3110_s7 + $0x8] sm:$0xff]  ;;  %v196_v18 = vld [vmem:[%s3110_s7] sm:$0xff]  ;;  %v198_v19 = vld [vmem:[%s3110_s7 + $0x10] sm:$0xff]  ;;  %s3122_s1 = sld [smem:[%s4455_s0 + %s3941_s28]]   ;;  %s3944_s10 = smov 16  }
  0x10   :  { %3531 = vmatprep.subr.mxu1 %v569_v12  ;;  %3539 = vmatprep.subr.mxu0 %v568_v13  ;;  %v199_v21 = vld [vmem:[%s3110_s7 + $0x18] sm:$0xff]  ;;  %v200_v23 = vld [vmem:[%s3110_s7 + $0x20] sm:$0xff]  ;;  %v201_v25 = vld [vmem:[%s3110_s7 + $0x28] sm:$0xff]  ;;  %s3124_s5 = sld [smem:[%s4455_s0 + %s3942_s2]]   ;;  %s3945_s14 = smov 32  }
  0x11   :  { %3532 = vmatpush3.msra.mxu1 %v569_v12  ;;  %160 = vperm.xlu1 %3925, %v149_v15   ;;  %v151_v22 = vld [vmem:[%s4024_s3 + $0x18] sm:$0xff]  ;;  %v152_v24 = vld [vmem:[%s4024_s3 + $0x20] sm:$0xff]  ;;  %v153_v26 = vld [vmem:[%s4024_s3 + $0x28] sm:$0xff]  ;;  %s3138_s9 = sld [smem:[%s4455_s0 + %s3943_s6]]   ;;  %s3946_s18 = smov 19  }
  0x12   :  { %3519 = vmatmul.mubr.msk.f32.gmra.mxu1 %vm269_vm0, %v4008_v11  ;;  %157 = vperm.xlu0 %3924, %v148_v16   ;;  %v202_v27 = vld [vmem:[%s3110_s7 + $0x30] sm:$0xff]  ;;  %v203_v29 = vld [vmem:[%s3110_s7 + $0x38] sm:$0xff]  ;;  %v3144_v32 = vld [vmem:[%s3113_s11] ss:$0 sm:$0xff]  ;;  %s3123_s13 = sld [smem:[%s4455_s0 + %s3944_s10]]   ;;  %s3947_s22 = smov 20  }
  0x13   :  { %3533 = vmatprep.mubr.msk.f32.mxu1 %vm269_vm0, %v3988_v7  ;;  %v154_v28 = vld [vmem:[%s4024_s3 + $0x30] sm:$0xff]  ;;  %v155_v30 = vld [vmem:[%s4024_s3 + $0x38] sm:$0xff]  ;;  %s3139_s17 = sld [smem:[%s4455_s0 + %s3945_s14]]   ;;  %s3948_s26 = smov 21  }
  0x14   :  { %s3126_s21 = sld [smem:[%s4455_s0 + %s3946_s18]]   ;;  %s3949_s30 = smov 18  }
  0x15   :  { %208 = vperm.xlu1 %3925, %v197_v17   ;;  %s4253_s25 = sld [smem:[%s4455_s0 + %s3947_s22]]   ;;  %s3950_s4 = smov 22  }
  0x16   :  { %3534 = vmatmul.mubr.msk.f32.vlgmr.msra.gmra.mxu1 %vm269_vm0, %v3992_v9  ;;  %205 = vperm.xlu0 %3924, %v196_v18   ;;  %s3128_s29 = sld [smem:[%s4455_s0 + %s3948_s26]]   ;;  %s3951_s8 = smov 24  }
  0x17   :  { %3536 = vmatprep.mubr.msk.f32.mxu1 %vm269_vm0, %v4004_v10  ;;  %s3125_s3 = sld [smem:[%s4455_s0 + %s3949_s30]]   ;;  %s3952_s12 = smov 26  }
  0x18   :  { %s3129_s7 = sld [smem:[%s4455_s0 + %s3950_s4]]   ;;  %s3953_s16 = smov 23  }
  0x19   :  { %211 = vperm.xlu1 %3925, %v198_v19   ;;  %s3131_s11 = sld [smem:[%s4455_s0 + %s3951_s8]]   ;;  %s3954_s20 = smov 25  }
  0x1a   :  { %3537 = vmatmul.mubr.msk.f32.gmra.mxu1 %vm269_vm0, %v4008_v11  ;;  %163 = vperm.xlu0 %3924, %v150_v20   ;;  %s3955_s24 = smov 27   ;;  %s3956_s28 = smov 29  }
  0x1b   :  { %s3957_s2 = smov 28   ;;  %s3958_s6 = smov 33  }
  0x1c   :  { %s3959_s10 = smov 30   ;;  %s3961_s14 = smov 4  }
  0x1d   :  { %214 = vperm.xlu1 %3925, %v199_v21   ;;  %s3962_s18 = smov 34   ;;  %s3963_s22 = smov 35  }
  0x1e   :  { %166 = vperm.xlu0 %3924, %v151_v22  }
  0x21   :  { %217 = vperm.xlu1 %3925, %v200_v23  }
  0x22   :  { %169 = vperm.xlu0 %3924, %v152_v24  }
  0x25   :  { %220 = vperm.xlu1 %3925, %v201_v25  }
  0x26   :  { %172 = vperm.xlu0 %3924, %v153_v26  }
  0x29   :  { %223 = vperm.xlu1 %3925, %v202_v27  }
  0x2a   :  { %175 = vperm.xlu0 %3924, %v154_v28  }
  0x2d   :  { %226 = vperm.xlu1 %3925, %v203_v29  }
  0x2e   :  { %178 = vperm.xlu0 %3924, %v155_v30  }
  0x8c   :  { %v161_v43 = vpop.permute.xlu1 %160 }
  0x8d   :  { %v158_v44 = vpop.permute.xlu0 %157  ;;  %vm181_vm2 = vcmp.eq.s32.totalorder %v4066_v42, %v161_v43 }
  0x8e   :  { %vm180_vm3 = vcmp.eq.s32.totalorder %v4066_v42, %v158_v44  ;;  %v4075_v47 = vsel %vm181_vm2, 1.0, %v3936_v45 }
  0x8f   :  { %v4071_v46 = vsel %vm180_vm3, 1.0, %v3936_v45 }
  0x90   :  { %1162 = vxpose.xlu0.b32.start [1/8] (short) (narrow) %v4071_v46, 32  ;;  %v209_v0 = vpop.permute.xlu1 %208 }
  0x91   :  { %v206_v48 = vpop.permute.xlu0 %205  ;;  %vm229_vm12 = vcmp.eq.s32.totalorder %v4066_v42, %v209_v0 }
  0x92   :  { %vm228_vm9 = vcmp.eq.s32.totalorder %v4066_v42, %v206_v48 }
  0x93   :  { %v4105_v60 = vsel %vm228_vm9, 1.0, %v3936_v45 }
  0x94   :  { %1163 = vxpose.xlu0.b32.cont [2/8] (short) (narrow) %v4075_v47, 32  ;;  %3557 = vmatprep.mubr.msk.f32.mxu1 %vm740_vm11, %v4105_v60  ;;  %v212_v2 = vpop.permute.xlu1 %211 }
  0x95   :  { %v164_v49 = vpop.permute.xlu0 %163  ;;  %vm230_vm13 = vcmp.eq.s32.totalorder %v4066_v42, %v212_v2  ;;  %v3181_v2 = vld [vmem:[%s3118_s23] ss:$0 sm:$0xff]  ;;  %s3132_s23 = sld [smem:[%s4455_s0 + %s3954_s20]]  }
  0x96   :  { %vm182_vm4 = vcmp.eq.s32.totalorder %v4066_v42, %v164_v49  ;;  %v1025_v49 = vld [vmem:[%s3119_s15 + $0x18] sm:$0xff] }
  0x97   :  { %v4080_v50 = vsel %vm182_vm4, 1.0, %v3936_v45 }
  0x98   :  { %1164 = vxpose.xlu0.b32.cont [3/8] (short) (narrow) %v4080_v50, 32  ;;  %v215_v8 = vpop.permute.xlu1 %214 }
  0x99   :  { %v167_v51 = vpop.permute.xlu0 %166  ;;  %vm231_vm14 = vcmp.eq.s32.totalorder %v4066_v42, %v215_v8 }
  0x9a   :  { %vm183_vm5 = vcmp.eq.s32.totalorder %v4066_v42, %v167_v51  ;;  %v1024_v51 = vld [vmem:[%s3119_s15 + $0x10] sm:$0xff] }
  0x9b   :  { %v4085_v52 = vsel %vm183_vm5, 1.0, %v3936_v45  ;;  %vm1194_vm5 = vcmask 523264  }
  0x9c   :  { %1165 = vxpose.xlu0.b32.cont [4/8] (short) (narrow) %v4085_v52, 32  ;;  %v218_v18 = vpop.permute.xlu1 %217 }
  0x9d   :  { %v170_v53 = vpop.permute.xlu0 %169  ;;  %vm232_vm15 = vcmp.eq.s32.totalorder %v4066_v42, %v218_v18 }
  0x9e   :  { %vm184_vm6 = vcmp.eq.s32.totalorder %v4066_v42, %v170_v53  ;;  %v1022_v53 = vld [vmem:[%s3119_s15] sm:$0xff] }
  0x9f   :  { %v4090_v54 = vsel %vm184_vm6, 1.0, %v3936_v45 }
  0xa0   :  { %1166 = vxpose.xlu0.b32.cont [5/8] (short) (narrow) %v4090_v54, 32  ;;  %v221_v28 = vpop.permute.xlu1 %220 }
  0xa1   :  { %v173_v55 = vpop.permute.xlu0 %172  ;;  %vm233_vm2 = vcmp.eq.s32.totalorder %v4066_v42, %v221_v28 }
  0xa2   :  { %vm185_vm7 = vcmp.eq.s32.totalorder %v4066_v42, %v173_v55  ;;  %v4157_v43 = vsel %vm233_vm2, 1.0, %v3936_v45  ;;  %v1293_v55 = vld [vmem:[%s3121_s19 + $0x8] sm:$0xff] }
  0xa3   :  { %v4095_v56 = vsel %vm185_vm7, 1.0, %v3936_v45 }
  0xa4   :  { %1167 = vxpose.xlu0.b32.cont [6/8] (short) (narrow) %v4095_v56, 32 }
  0xa5   :  { %v176_v57 = vpop.permute.xlu0 %175 }
  0xa6   :  { %vm186_vm8 = vcmp.eq.s32.totalorder %v4066_v42, %v176_v57 }
  0xa7   :  { %v4100_v58 = vsel %vm186_vm8, 1.0, %v3936_v45 }
  0xa8   :  { %1168 = vxpose.xlu0.b32.cont [7/8] (short) (narrow) %v4100_v58, 32 }
  0xa9   :  { %v179_v59 = vpop.permute.xlu0 %178 }
  0xaa   :  { %vm187_vm10 = vcmp.eq.s32.totalorder %v4066_v42, %v179_v59 }
  0xab   :  { %v4109_v61 = vsel %vm187_vm10, 1.0, %v3936_v45 }
  0xac   :  { %1169 = vxpose.xlu0.b32.end [8/8] (short) (narrow) %v4109_v61, 32 }
  0xca   :  { %v3509_v31 = vpop.f32.mrf.mxu0 }
  0xcb   :  { %v4042_v35 = vadd.f32 %v3509_v31, %v3144_v32  ;;  %v4127_v31 = vsel %vm229_vm12, 1.0, %v3936_v45 }
  0xcc   :  { %v348_v33 = vpop.f32.mrf.mxu0 }
  0xcd   :  { %v4040_v34 = vadd.f32 %v3144_v32, %v348_v33  ;;  %v4130_v33 = vsel %vm230_vm13, 1.0, %v3936_v45 }
  0xce   :  { %v3512_v36 = vpop.f32.mrf.mxu0  ;;  %v3517_v62 = vpop.f32.mrf.mxu1 }
  0xcf   :  { %3525 = vmatprep.mubr.msk.f32.mxu0 %vm469_vm1, %v4040_v34  ;;  %v4051_v40 = vadd.f32 %v3512_v36, %v3144_v32  ;;  %v4143_v36 = vsel %vm231_vm14, 1.0, %v3936_v45 }
  0xd0   :  { %v358_v38 = vpop.f32.mrf.mxu0  ;;  %3526 = vmatmul.mubr.msk.f32.vlgmr.msra.gmra.mxu0 %vm469_vm1, %v4042_v35  ;;  %v450_v63 = vpop.f32.mrf.mxu1 }
  0xd1   :  { %v4049_v39 = vadd.f32 %v3144_v32, %v358_v38  ;;  %3540 = vmatpush3.msra.mxu0 %v568_v13  ;;  %v224_v32 = vpop.permute.xlu1 %223 }
  0xd2   :  { %3541 = vmatprep.subr.mxu0 %v567_v37  ;;  %v3520_v1 = vpop.f32.mrf.mxu1  ;;  %vm234_vm3 = vcmp.eq.s32.totalorder %v4066_v42, %v224_v32 }
  0xd3   :  { %3528 = vmatprep.mubr.msk.f32.mxu0 %vm469_vm1, %v4049_v39  ;;  %3542 = vmatpush3.msra.mxu0 %v567_v37  ;;  %v4146_v37 = vsel %vm232_vm15, 1.0, %v3936_v45  ;;  %v4160_v44 = vsel %vm234_vm3, 1.0, %v3936_v45 }
  0xd4   :  { %3529 = vmatmul.mubr.msk.f32.gmra.mxu0 %vm469_vm1, %v4051_v40  ;;  %v460_v3 = vpop.f32.mrf.mxu1 }
  0xd5   :  { %3543 = vmatprep.mubr.msk.f32.mxu0 %vm469_vm1, %v4040_v34  ;;  %v227_v38 = vpop.permute.xlu1 %226 }
  0xd6   :  { %v3535_v6 = vpop.f32.mrf.mxu1  ;;  %vm235_vm4 = vcmp.eq.s32.totalorder %v4066_v42, %v227_v38  ;;  %v1023_v42 = vld [vmem:[%s3119_s15 + $0x8] sm:$0xff]  ;;  %s4370_s15 = sld [smem:[%s4455_s0 + %s3952_s12]]  }
  0xd7   :  { %v4168_v48 = vsel %vm235_vm4, 1.0, %v3936_v45 }
  0xd8   :  { %3544 = vmatmul.mubr.msk.f32.vlgmr.msra.gmra.mxu0 %vm469_vm1, %v4042_v35  ;;  %v636_v15 = vpop.f32.mrf.mxu1 }
  0xd9   :  { %3546 = vmatprep.mubr.msk.f32.mxu0 %vm469_vm1, %v4049_v39 }
  0xda   :  { %v3538_v20 = vpop.f32.mrf.mxu1 }
  0xdc   :  { %3547 = vmatmul.mubr.msk.f32.gmra.mxu0 %vm469_vm1, %v4051_v40  ;;  %v646_v25 = vpop.f32.mrf.mxu1 }
  0xdd   :  { %3577 = vmatprep.mubr.msk.f32.mxu0 %vm740_vm11, %v4071_v46 }
 0x190   :  { %v3527_v4 = vpop.f32.mrf.mxu0 }
 0x191   :  { %v554_v19 = vadd.f32 %v3527_v4, %v3517_v62 }
 0x192   :  { %v548_v5 = vpop.f32.mrf.mxu0 }
 0x193   :  { %v549_v22 = vadd.f32 %v548_v5, %v450_v63 }
 0x194   :  { %v3530_v12 = vpop.f32.mrf.mxu0 }
 0x195   :  { %v564_v13 = vadd.f32 %v3530_v12, %v3520_v1 }
 0x196   :  { %v558_v14 = vpop.f32.mrf.mxu0 }
 0x197   :  { %v559_v16 = vadd.f32 %v558_v14, %v460_v3  ;;  %3569 = vmatprep.subr.mxu0 %v564_v13 }
 0x198   :  { %v3545_v17 = vpop.f32.mrf.mxu0  ;;  %3570 = vmatpush3.msra.mxu0 %v564_v13 }
 0x199   :  { %3571 = vmatprep.subr.mxu0 %v559_v16  ;;  %v727_v29 = vadd.f32 %v3545_v17, %v3535_v6 }
 0x19a   :  { %v721_v21 = vpop.f32.mrf.mxu0  ;;  %3572 = vmatpush3.msra.mxu0 %v559_v16 }
 0x19b   :  { %3573 = vmatprep.subr.mxu0 %v554_v19  ;;  %v722_v30 = vadd.f32 %v721_v21, %v636_v15 }
 0x19c   :  { %v3548_v23 = vpop.f32.mrf.mxu0  ;;  %3574 = vmatpush3.msra.mxu0 %v554_v19 }
 0x19d   :  { %v737_v24 = vadd.f32 %v3548_v23, %v3538_v20  ;;  %3575 = vmatprep.subr.mxu0 %v549_v22  ;;  %v1292_v23 = vld [vmem:[%s3121_s19] sm:$0xff]  ;;  %s3130_s19 = sld [smem:[%s4455_s0 + %s3953_s16]]  }
 0x19e   :  { %v731_v26 = vpop.f32.mrf.mxu0  ;;  %3576 = vmatpush3.msra.mxu0 %v549_v22 }
 0x19f   :  { %v732_v27 = vadd.f32 %v731_v26, %v646_v25  ;;  %3549 = vmatprep.subr.mxu1 %v737_v24  ;;  %3578 = vmatmul.mubr.msk.f32.vlgmr.msra.gmra.mxu0 %vm740_vm11, %v4075_v47 }
 0x1a0   :  { %3550 = vmatpush3.msra.mxu1 %v737_v24  ;;  %3580 = vmatprep.mubr.msk.f32.mxu0 %vm740_vm11, %v4080_v50 }
 0x1a1   :  { %3551 = vmatprep.subr.mxu1 %v732_v27 }
 0x1a2   :  { %3552 = vmatpush3.msra.mxu1 %v732_v27 }
 0x1a3   :  { %3553 = vmatprep.subr.mxu1 %v727_v29  ;;  %3581 = vmatmul.mubr.msk.f32.gmra.mxu0 %vm740_vm11, %v4085_v52 }
 0x1a4   :  { %3554 = vmatpush3.msra.mxu1 %v727_v29  ;;  %3583 = vmatprep.mubr.msk.f32.mxu0 %vm740_vm11, %v4090_v54 }
 0x1a5   :  { %3555 = vmatprep.subr.mxu1 %v722_v30 }
 0x1a6   :  { %3556 = vmatpush3.msra.mxu1 %v722_v30 }
 0x1a7   :  { %3558 = vmatmul.mubr.msk.f32.vlgmr.msra.gmra.mxu1 %vm740_vm11, %v4127_v31  ;;  %3584 = vmatmul.mubr.msk.f32.gmra.mxu0 %vm740_vm11, %v4095_v56 }
 0x1a8   :  { %3560 = vmatprep.mubr.msk.f32.mxu1 %vm740_vm11, %v4130_v33  ;;  %3586 = vmatprep.mubr.msk.f32.mxu0 %vm740_vm11, %v4100_v58 }
 0x1a9   :  { %3589 = vmatprep.subr.mxu1 %v1025_v49 }
 0x1aa   :  { %3590 = vmatpush3.msra.mxu1 %v1025_v49 }
 0x1ab   :  { %3561 = vmatmul.mubr.msk.f32.gmra.mxu1 %vm740_vm11, %v4143_v36  ;;  %3587 = vmatmul.mubr.msk.f32.gmra.mxu0 %vm740_vm11, %v4109_v61 }
 0x1ac   :  { %3563 = vmatprep.mubr.msk.f32.mxu1 %vm740_vm11, %v4146_v37  ;;  %3591 = vmatprep.subr.mxu1 %v1024_v51 }
 0x1ad   :  { %3592 = vmatpush3.msra.mxu1 %v1024_v51 }
 0x1ae   :  { %3593 = vmatprep.subr.mxu1 %v1023_v42 }
 0x1af   :  { %3564 = vmatmul.mubr.msk.f32.gmra.mxu1 %vm740_vm11, %v4157_v43 }
 0x1b0   :  { %3566 = vmatprep.mubr.msk.f32.mxu1 %vm740_vm11, %v4160_v44  ;;  %3594 = vmatpush3.msra.mxu1 %v1023_v42 }
 0x1b1   :  { %3595 = vmatprep.subr.mxu1 %v1022_v53 }
 0x1b2   :  { %3596 = vmatpush3.msra.mxu1 %v1022_v53 }
 0x1b3   :  { %3567 = vmatmul.mubr.msk.f32.gmra.mxu1 %vm740_vm11, %v4168_v48  ;;  %3645 = vmatprep.subr.mxu1 %v1293_v55 }
 0x25f   :  { %v3579_v57 = vpop.f32.mrf.mxu0 }
 0x261   :  { %v960_v59 = vpop.f32.mrf.mxu0 }
 0x263   :  { %v3582_v62 = vpop.f32.mrf.mxu0 }
 0x265   :  { %v970_v63 = vpop.f32.mrf.mxu0 }
 0x267   :  { %v3559_v0 = vpop.f32.mrf.mxu1  ;;  %v3585_v3 = vpop.f32.mrf.mxu0 }
 0x268   :  { %v966_v1 = vadd.f32 %v3579_v57, %v3559_v0  ;;  %v4197_v0 = vpop.trf.xlu0 }
 0x269   :  { %v831_v4 = vpop.f32.mrf.mxu1  ;;  %v980_v14 = vpop.f32.mrf.mxu0  ;;  %3625 = vmatprep.mubr.msk.f32.mxu0 %vm1194_vm5, %v4197_v0 }
 0x26a   :  { %v961_v5 = vadd.f32 %v960_v59, %v831_v4  ;;  %v1007_v6 = vadd.f32 %v3181_v2, %v966_v1 }
 0x26b   :  { %v3562_v8 = vpop.f32.mrf.mxu1  ;;  %v3588_v24 = vpop.f32.mrf.mxu0 }
 0x26c   :  { %v1006_v12 = vadd.f32 %v3181_v2, %v961_v5  ;;  %v976_v13 = vadd.f32 %v3582_v62, %v3562_v8  ;;  %v1015_v18 = vmax.f32 %v1007_v6, 0.0  ;;  %v3182_v8 = vld [vmem:[%s3120_s27] ss:$0 sm:$0xff]  ;;  %s3134_s27 = sld [smem:[%s4455_s0 + %s3955_s24]]  }
 0x26d   :  { %v841_v15 = vpop.f32.mrf.mxu1  ;;  %v990_v49 = vpop.f32.mrf.mxu0 }
 0x26e   :  { %v1014_v16 = vmax.f32 %v1006_v12, 0.0  ;;  %v971_v17 = vadd.f32 %v970_v63, %v841_v15  ;;  %v1009_v19 = vadd.f32 %v3181_v2, %v976_v13 }
 0x26f   :  { %v3565_v20 = vpop.f32.mrf.mxu1 }
 0x270   :  { %v1008_v21 = vadd.f32 %v3181_v2, %v971_v17  ;;  %v986_v22 = vadd.f32 %v3585_v3, %v3565_v20  ;;  %3597 = vmatprep.mubr.msk.f32.mxu1 %vm740_vm11, %v1014_v16  ;;  %v1017_v28 = vmax.f32 %v1009_v19, 0.0 }
 0x271   :  { %v851_v25 = vpop.f32.mrf.mxu1  ;;  %3598 = vmatmul.mubr.msk.f32.vlgmr.msra.gmra.mxu1 %vm740_vm11, %v1015_v18  ;;  %v4204_v18 = vpop.trf.xlu0 }
 0x272   :  { %v1016_v26 = vmax.f32 %v1008_v21, 0.0  ;;  %v981_v27 = vadd.f32 %v980_v14, %v851_v25  ;;  %3646 = vmatpush3.msra.mxu1 %v1293_v55  ;;  %v1011_v29 = vadd.f32 %v3181_v2, %v986_v22  ;;  %v1296_v25 = vld [vmem:[%s3122_s1 + $0x10] sm:$0xff] }
 0x273   :  { %v3568_v30 = vpop.f32.mrf.mxu1  ;;  %3647 = vmatprep.subr.mxu1 %v1292_v23 }
 0x274   :  { %v1010_v32 = vadd.f32 %v3181_v2, %v981_v27  ;;  %v996_v38 = vadd.f32 %v3588_v24, %v3568_v30  ;;  %3600 = vmatprep.mubr.msk.f32.mxu1 %vm740_vm11, %v1016_v26  ;;  %3648 = vmatpush3.msra.mxu1 %v1292_v23  ;;  %v1019_v57 = vmax.f32 %v1011_v29, 0.0  ;;  %v1297_v24 = vld [vmem:[%s3122_s1 + $0x18] sm:$0xff]  ;;  %v1295_v27 = vld [vmem:[%s3122_s1 + $0x8] sm:$0xff] }
 0x275   :  { %v861_v51 = vpop.f32.mrf.mxu1  ;;  %3601 = vmatmul.mubr.msk.f32.gmra.mxu1 %vm740_vm11, %v1017_v28  ;;  %v4209_v22 = vpop.trf.xlu0  ;;  %v1294_v28 = vld [vmem:[%s3122_s1] sm:$0xff]  ;;  %s3136_s1 = sld [smem:[%s4455_s0 + %s3956_s28]]  }
 0x276   :  { %v1018_v42 = vmax.f32 %v1010_v32, 0.0  ;;  %v991_v53 = vadd.f32 %v990_v49, %v861_v51  ;;  %v1013_v59 = vadd.f32 %v3181_v2, %v996_v38  ;;  %v1498_v49 = vld [vmem:[%s3124_s5 + $0x18] sm:$0xff]  ;;  %v1497_v51 = vld [vmem:[%s3124_s5 + $0x10] sm:$0xff] }
 0x278   :  { %v1012_v62 = vadd.f32 %v3181_v2, %v991_v53  ;;  %3603 = vmatprep.mubr.msk.f32.mxu1 %vm740_vm11, %v1018_v42  ;;  %v1021_v63 = vmax.f32 %v1013_v59, 0.0  ;;  %v1496_v42 = vld [vmem:[%s3124_s5 + $0x8] sm:$0xff]  ;;  %v1495_v53 = vld [vmem:[%s3124_s5] sm:$0xff]  ;;  %s3135_s5 = sld [smem:[%s4455_s0 + %s3957_s2]]  }
 0x279   :  { %3604 = vmatmul.mubr.msk.f32.gmra.mxu1 %vm740_vm11, %v1019_v57  ;;  %v4215_v26 = vpop.trf.xlu0  ;;  %v368_v57 = vld [vmem:[%s3138_s9 + $0x8] sm:$0xff] }
 0x27a   :  { %v1020_v55 = vmax.f32 %v1012_v62, 0.0 }
 0x27c   :  { %3606 = vmatprep.mubr.msk.f32.mxu1 %vm740_vm11, %v1020_v55 }
 0x27d   :  { %3607 = vmatmul.mubr.msk.f32.gmra.mxu1 %vm740_vm11, %v1021_v63 }
 0x27e   :  { %3649 = vmatprep.mubr.msk.f32.mxu1 %vm469_vm1, %v4040_v34 }
 0x281   :  { %3650 = vmatmul.mubr.msk.f32.vlgmr.msra.gmra.mxu1 %vm469_vm1, %v4042_v35 }
 0x282   :  { %3652 = vmatprep.mubr.msk.f32.mxu1 %vm469_vm1, %v4049_v39 }
 0x285   :  { %3653 = vmatmul.mubr.msk.f32.gmra.mxu1 %vm469_vm1, %v4051_v40 }
 0x331   :  { %v3599_v1 = vpop.f32.mrf.mxu1 }
 0x332   :  { %v1129_v21 = vadd.f32 %v3599_v1, %v3182_v8  ;;  %v3203_v1 = vld [vmem:[%s3123_s13] ss:$0 sm:$0xff]  ;;  %s3137_s13 = sld [smem:[%s4455_s0 + %s3959_s10]]  }
 0x333   :  { %v1123_v2 = vpop.f32.mrf.mxu1 }
 0x334   :  { %v1124_v23 = vadd.f32 %v3182_v8, %v1123_v2 }
 0x335   :  { %v3602_v3 = vpop.f32.mrf.mxu1 }
 0x336   :  { %v1139_v19 = vadd.f32 %v3602_v3, %v3182_v8 }
 0x337   :  { %v1133_v4 = vpop.f32.mrf.mxu1 }
 0x338   :  { %v1134_v20 = vadd.f32 %v3182_v8, %v1133_v4 }
 0x339   :  { %v3605_v5 = vpop.f32.mrf.mxu1 }
 0x33a   :  { %v1149_v16 = vadd.f32 %v3605_v5, %v3182_v8 }
 0x33b   :  { %v1143_v6 = vpop.f32.mrf.mxu1 }
 0x33c   :  { %v1144_v17 = vadd.f32 %v3182_v8, %v1143_v6 }
 0x33d   :  { %v3608_v12 = vpop.f32.mrf.mxu1 }
 0x33e   :  { %v1159_v13 = vadd.f32 %v3608_v12, %v3182_v8 }
 0x33f   :  { %v1153_v14 = vpop.f32.mrf.mxu1 }
 0x340   :  { %v1154_v15 = vadd.f32 %v3182_v8, %v1153_v14  ;;  %3609 = vmatprep.subr.mxu0 %v1159_v13 }
 0x341   :  { %3610 = vmatpush3.msra.mxu0 %v1159_v13  ;;  %v3651_v59 = vpop.f32.mrf.mxu1 }
 0x342   :  { %3611 = vmatprep.subr.mxu0 %v1154_v15 }
 0x343   :  { %3612 = vmatpush3.msra.mxu0 %v1154_v15  ;;  %v1461_v62 = vpop.f32.mrf.mxu1 }
 0x344   :  { %3613 = vmatprep.subr.mxu0 %v1149_v16 }
 0x345   :  { %3614 = vmatpush3.msra.mxu0 %v1149_v16  ;;  %v3654_v2 = vpop.f32.mrf.mxu1 }
 0x346   :  { %3615 = vmatprep.subr.mxu0 %v1144_v17 }
 0x347   :  { %3616 = vmatpush3.msra.mxu0 %v1144_v17  ;;  %v1471_v13 = vpop.f32.mrf.mxu1 }
 0x348   :  { %3617 = vmatprep.subr.mxu0 %v1139_v19 }
 0x349   :  { %3618 = vmatpush3.msra.mxu0 %v1139_v19 }
 0x34a   :  { %3619 = vmatprep.subr.mxu0 %v1134_v20 }
 0x34b   :  { %3620 = vmatpush3.msra.mxu0 %v1134_v20 }
 0x34c   :  { %3621 = vmatprep.subr.mxu0 %v1129_v21 }
 0x34d   :  { %3622 = vmatpush3.msra.mxu0 %v1129_v21  ;;  %v367_v21 = vld [vmem:[%s3138_s9] sm:$0xff]  ;;  %s3140_s9 = sld [smem:[%s4455_s0 + %s3958_s6]]  }
 0x34e   :  { %3623 = vmatprep.subr.mxu0 %v1124_v23 }
 0x34f   :  { %3624 = vmatpush3.msra.mxu0 %v1124_v23 }
 0x350   :  { %3626 = vmatmul.mubr.msk.f32.vlgmr.msra.gmra.mxu0 %vm1194_vm5, %v4204_v18  ;;  %3631 = vmatprep.subr.mxu0 %v1297_v24 }
 0x351   :  { %3628 = vmatprep.mubr.msk.f32.mxu0 %vm1194_vm5, %v4209_v22  ;;  %3632 = vmatpush3.msra.mxu0 %v1297_v24 }
 0x352   :  { %3633 = vmatprep.subr.mxu0 %v1296_v25 }
 0x353   :  { %3634 = vmatpush3.msra.mxu0 %v1296_v25  ;;  %v1796_v25 = vld [vmem:[%s3126_s21 + $0x18] sm:$0xff] }
 0x354   :  { %3629 = vmatmul.mubr.msk.f32.gmra.mxu0 %vm1194_vm5, %v4215_v26  ;;  %3635 = vmatprep.subr.mxu0 %v1295_v27 }
 0x355   :  { %3636 = vmatpush3.msra.mxu0 %v1295_v27  ;;  %v1794_v27 = vld [vmem:[%s3126_s21 + $0x8] sm:$0xff] }
 0x356   :  { %3637 = vmatprep.subr.mxu0 %v1294_v28 }
 0x357   :  { %3638 = vmatpush3.msra.mxu0 %v1294_v28  ;;  %v1607_v28 = vld [vmem:[%s3139_s17] sm:$0xff] }
 0x358   :  { %3655 = vmatprep.subr.mxu0 %v1498_v49 }
 0x410   :  { %v3627_v29 = vpop.f32.mrf.mxu0 }
 0x412   :  { %v1273_v30 = vpop.f32.mrf.mxu0 }
 0x413   :  { %3639 = vmatprep.mubr.msk.f32.mxu0 %vm740_vm11, %v1273_v30  ;;  %v1971_v30 = vld [vmem:[%s4253_s25 + $0x18] sm:$0xff] }
 0x414   :  { %v3630_v32 = vpop.f32.mrf.mxu0  ;;  %3640 = vmatmul.mubr.msk.f32.vlgmr.msra.gmra.mxu0 %vm740_vm11, %v3627_v29  ;;  %v1793_v29 = vld [vmem:[%s3126_s21] sm:$0xff] }
 0x415   :  { %3656 = vmatpush3.msra.mxu0 %v1498_v49 }
 0x416   :  { %v1283_v38 = vpop.f32.mrf.mxu0  ;;  %3657 = vmatprep.subr.mxu0 %v1497_v51 }
 0x417   :  { %3642 = vmatprep.mubr.msk.f32.mxu0 %vm740_vm11, %v1283_v38  ;;  %3658 = vmatpush3.msra.mxu0 %v1497_v51  ;;  %v3204_v38 = vld [vmem:[%s3125_s3] ss:$0 sm:$0xff] }
 0x418   :  { %3643 = vmatmul.mubr.msk.f32.gmra.mxu0 %vm740_vm11, %v3630_v32  ;;  %3659 = vmatprep.subr.mxu0 %v1496_v42  ;;  %v1797_v32 = vld [vmem:[%s3128_s29] sm:$0xff] }
 0x419   :  { %3660 = vmatpush3.msra.mxu0 %v1496_v42 }
 0x41a   :  { %3661 = vmatprep.subr.mxu0 %v1495_v53 }
 0x41b   :  { %3662 = vmatpush3.msra.mxu0 %v1495_v53 }
 0x41c   :  { %3683 = vmatprep.subr.mxu0 %v368_v57 }
 0x4d4   :  { %v3641_v55 = vpop.f32.mrf.mxu0 }
 0x4d5   :  { %v1467_v63 = vadd.f32 %v3651_v59, %v3641_v55 }
 0x4d6   :  { %v1376_v3 = vpop.f32.mrf.mxu0 }
 0x4d7   :  { %v1462_v4 = vadd.f32 %v1461_v62, %v1376_v3  ;;  %v1488_v5 = vadd.f32 %v3203_v1, %v1467_v63  ;;  %v1972_v3 = vld [vmem:[%s3129_s7] sm:$0xff] }
 0x4d8   :  { %v3644_v6 = vpop.f32.mrf.mxu0 }
 0x4d9   :  { %v1487_v8 = vadd.f32 %v3203_v1, %v1462_v4  ;;  %v1477_v12 = vadd.f32 %v3654_v2, %v3644_v6  ;;  %v1492_v17 = vmax.f32 %v1488_v5, 0.0  ;;  %v1970_v2 = vld [vmem:[%s4253_s25 + $0x10] sm:$0xff]  ;;  %v1969_v6 = vld [vmem:[%s4253_s25 + $0x8] sm:$0xff] }
 0x4da   :  { %v1386_v14 = vpop.f32.mrf.mxu0 }
 0x4db   :  { %v1491_v15 = vmax.f32 %v1487_v8, 0.0  ;;  %v1472_v16 = vadd.f32 %v1471_v13, %v1386_v14  ;;  %v1490_v19 = vadd.f32 %v3203_v1, %v1477_v12  ;;  %v1968_v8 = vld [vmem:[%s4253_s25] sm:$0xff]  ;;  %s3142_s25 = sld [smem:[%s4455_s0 + %s3963_s22]]  }
 0x4dd   :  { %v1489_v20 = vadd.f32 %v3203_v1, %v1472_v16  ;;  %3663 = vmatprep.mubr.msk.f32.mxu0 %vm740_vm11, %v1491_v15  ;;  %v1494_v24 = vmax.f32 %v1490_v19, 0.0 }
 0x4de   :  { %3664 = vmatmul.mubr.msk.f32.vlgmr.msra.gmra.mxu0 %vm740_vm11, %v1492_v17 }
 0x4df   :  { %v1493_v23 = vmax.f32 %v1489_v20, 0.0  ;;  %3684 = vmatpush3.msra.mxu0 %v368_v57 }
 0x4e0   :  { %3685 = vmatprep.subr.mxu0 %v367_v21 }
 0x4e1   :  { %3666 = vmatprep.mubr.msk.f32.mxu0 %vm740_vm11, %v1493_v23  ;;  %3686 = vmatpush3.msra.mxu0 %v367_v21 }
 0x4e2   :  { %3667 = vmatmul.mubr.msk.f32.gmra.mxu0 %vm740_vm11, %v1494_v24  ;;  %3701 = vmatprep.subr.mxu0 %v1796_v25 }
 0x4e3   :  { %3687 = vmatprep.mubr.msk.f32.mxu0 %vm469_vm1, %v4040_v34  ;;  %v1610_v34 = vld [vmem:[%s3139_s17 + $0x18] sm:$0xff] }
 0x4e4   :  { %3669 = vmatprep.subr.mxu1 %v1610_v34 }
 0x4e5   :  { %3670 = vmatpush3.msra.mxu1 %v1610_v34 }
 0x4e6   :  { %3688 = vmatmul.mubr.msk.f32.vlgmr.msra.gmra.mxu0 %vm469_vm1, %v4042_v35  ;;  %v1609_v35 = vld [vmem:[%s3139_s17 + $0x10] sm:$0xff] }
 0x4e7   :  { %3690 = vmatprep.mubr.msk.f32.mxu0 %vm469_vm1, %v4049_v39  ;;  %v1795_v39 = vld [vmem:[%s3126_s21 + $0x10] sm:$0xff]  ;;  %3702 = vmatpush3.msra.mxu0 %v1796_v25  ;;  %s3141_s21 = sld [smem:[%s4455_s0 + %s3962_s18]]  }
 0x4e8   :  { %3671 = vmatprep.subr.mxu1 %v1609_v35  ;;  %3703 = vmatprep.subr.mxu0 %v1795_v39 }
 0x4e9   :  { %3672 = vmatpush3.msra.mxu1 %v1609_v35  ;;  %3704 = vmatpush3.msra.mxu0 %v1795_v39 }
 0x4ea   :  { %3691 = vmatmul.mubr.msk.f32.gmra.mxu0 %vm469_vm1, %v4051_v40  ;;  %v1608_v40 = vld [vmem:[%s3139_s17 + $0x8] sm:$0xff]  ;;  %3705 = vmatprep.subr.mxu0 %v1794_v27  ;;  %s3111_s17 = sld [smem:[%s4455_s0 + %s3961_s14]]  }
 0x4eb   :  { %3673 = vmatprep.subr.mxu1 %v1608_v40  ;;  %3706 = vmatpush3.msra.mxu0 %v1794_v27 }
 0x4ec   :  { %3674 = vmatpush3.msra.mxu1 %v1608_v40  ;;  %3707 = vmatprep.subr.mxu0 %v1793_v29 }
 0x4ed   :  { %3675 = vmatprep.subr.mxu1 %v1607_v28  ;;  %3708 = vmatpush3.msra.mxu0 %v1793_v29 }
 0x4ee   :  { %3676 = vmatpush3.msra.mxu1 %v1607_v28  ;;  %3723 = vmatprep.subr.mxu0 %v1971_v30 }
 0x4ef   :  { %3693 = vmatprep.subr.mxu1 %v1797_v32 }
 0x59e   :  { %v3665_v49 = vpop.f32.mrf.mxu0 }
 0x59f   :  { %v1590_v51 = vadd.f32 %v3665_v49, %v3204_v38 }
 0x5a0   :  { %v1584_v42 = vpop.f32.mrf.mxu0 }
 0x5a1   :  { %v1585_v53 = vadd.f32 %v3204_v38, %v1584_v42  ;;  %v4267_v62 = vmax.f32 %v1590_v51, 0.0 }
 0x5a2   :  { %v3668_v57 = vpop.f32.mrf.mxu0 }
 0x5a3   :  { %v4265_v59 = vmax.f32 %v1585_v53, 0.0  ;;  %v1600_v55 = vadd.f32 %v3668_v57, %v3204_v38 }
 0x5a4   :  { %v1594_v63 = vpop.f32.mrf.mxu0 }
 0x5a5   :  { %v1595_v1 = vadd.f32 %v3204_v38, %v1594_v63  ;;  %3677 = vmatprep.mubr.msk.f32.mxu1 %vm740_vm11, %v4265_v59  ;;  %3709 = vmatprep.mubr.msk.f32.mxu0 %vm740_vm11, %v4265_v59  ;;  %v4280_v5 = vmax.f32 %v1600_v55, 0.0 }
 0x5a6   :  { %3678 = vmatmul.mubr.msk.f32.vlgmr.msra.gmra.mxu1 %vm740_vm11, %v4267_v62  ;;  %3710 = vmatmul.mubr.msk.f32.vlgmr.msra.gmra.mxu0 %vm740_vm11, %v4267_v62  ;;  %v4320_v12 = vpop.f32.mrf.mxu0 }
 0x5a7   :  { %v4278_v4 = vmax.f32 %v1595_v1, 0.0  ;;  %3694 = vmatpush3.msra.mxu1 %v1797_v32  ;;  %3724 = vmatpush3.msra.mxu0 %v1971_v30 }
 0x5a8   :  { %3725 = vmatprep.subr.mxu0 %v1970_v2  ;;  %3715 = vmatprep.subr.mxu1 %v1972_v3  ;;  %v4322_v13 = vpop.f32.mrf.mxu0 }
 0x5a9   :  { %3680 = vmatprep.mubr.msk.f32.mxu1 %vm740_vm11, %v4278_v4  ;;  %3712 = vmatprep.mubr.msk.f32.mxu0 %vm740_vm11, %v4278_v4 }
 0x5aa   :  { %3726 = vmatpush3.msra.mxu0 %v1970_v2  ;;  %3681 = vmatmul.mubr.msk.f32.gmra.mxu1 %vm740_vm11, %v4280_v5 }
 0x5ab   :  { %3713 = vmatmul.mubr.msk.f32.gmra.mxu0 %vm740_vm11, %v4280_v5  ;;  %3727 = vmatprep.subr.mxu0 %v1969_v6 }
 0x5ac   :  { %3728 = vmatpush3.msra.mxu0 %v1969_v6  ;;  %3731 = vmatprep.mubr.msk.f32.mxu0 %vm740_vm11, %v4265_v59 }
 0x5ad   :  { %3729 = vmatprep.subr.mxu0 %v1968_v8  ;;  %3695 = vmatprep.mubr.msk.f32.mxu1 %vm269_vm0, %v3988_v7 }
 0x5ae   :  { %3730 = vmatpush3.msra.mxu0 %v1968_v8  ;;  %3696 = vmatmul.mubr.msk.f32.vlgmr.msra.gmra.mxu1 %vm269_vm0, %v3992_v9 }
 0x5af   :  { %3732 = vmatmul.mubr.msk.f32.vlgmr.msra.gmra.mxu0 %vm740_vm11, %v4267_v62  ;;  %3716 = vmatpush3.msra.mxu1 %v1972_v3 }
 0x5b0   :  { %3734 = vmatprep.mubr.msk.f32.mxu0 %vm740_vm11, %v4278_v4  ;;  %3698 = vmatprep.mubr.msk.f32.mxu1 %vm269_vm0, %v4004_v10 }
 0x5b2   :  { %3699 = vmatmul.mubr.msk.f32.gmra.mxu1 %vm269_vm0, %v4008_v11 }
 0x5b3   :  { %3735 = vmatmul.mubr.msk.f32.gmra.mxu0 %vm740_vm11, %v4280_v5  ;;  %3717 = vmatprep.mubr.msk.f32.mxu1 %vm269_vm0, %v3988_v7  ;;  %v4324_v7 = vpop.f32.mrf.mxu0 }
 0x5b4   :  { %3765 = vmatprep.mubr.msk.f32.mxu0 %vm740_vm11, %v4071_v46 }
 0x5b5   :  { %v1784_v14 = vpop.f32.mrf.mxu0 }
 0x5b6   :  { %3718 = vmatmul.mubr.msk.f32.vlgmr.msra.gmra.mxu1 %vm269_vm0, %v3992_v9 }
 0x5b7   :  { %3720 = vmatprep.mubr.msk.f32.mxu1 %vm269_vm0, %v4004_v10 }
 0x5ba   :  { %3721 = vmatmul.mubr.msk.f32.gmra.mxu1 %vm269_vm0, %v4008_v11  ;;  %vm3960_vm0 = vmmov 0  }
 0x5bb   :  { %3745 = vmatprep.mubr.msk.f32.mxu1 %vm740_vm11, %v4105_v60 }
 0x666   :  { %v4326_v46 = vpop.f32.mrf.mxu1  ;;  %v3711_v15 = vpop.f32.mrf.mxu0 }
 0x668   :  { %v4328_v9 = vpop.f32.mrf.mxu1  ;;  %v1949_v16 = vpop.f32.mrf.mxu0 }
 0x66a   :  { %v4330_v10 = vpop.f32.mrf.mxu1 }
 0x66b   :  { %v3714_v17 = vpop.f32.mrf.mxu0 }
 0x66c   :  { %v1699_v11 = vpop.f32.mrf.mxu1 }
 0x66d   :  { %v4332_v19 = vadd.f32 %v1784_v14, %v1699_v11  ;;  %v1959_v60 = vpop.f32.mrf.mxu0 }
 0x66e   :  { %v3697_v20 = vpop.f32.mrf.mxu1 }
 0x66f   :  { %v3733_v21 = vpop.f32.mrf.mxu0  ;;  %v1955_v27 = vadd.f32 %v3711_v15, %v3697_v20  ;;  %v2603_v20 = vld [vmem:[%s4370_s15 + $0x10] sm:$0xff] }
 0x670   :  { %v1864_v23 = vpop.f32.mrf.mxu1 }
 0x671   :  { %v2124_v25 = vpop.f32.mrf.mxu0  ;;  %v1950_v30 = vadd.f32 %v1949_v16, %v1864_v23 }
 0x672   :  { %v3700_v24 = vpop.f32.mrf.mxu1 }
 0x673   :  { %v1965_v34 = vadd.f32 %v3714_v17, %v3700_v24  ;;  %v3736_v28 = vpop.f32.mrf.mxu0 }
 0x674   :  { %v1874_v35 = vpop.f32.mrf.mxu1 }
 0x675   :  { %v1960_v39 = vadd.f32 %v1959_v60, %v1874_v35  ;;  %3757 = vmatprep.subr.mxu0 %v1965_v34  ;;  %v2134_v49 = vpop.f32.mrf.mxu0 }
 0x676   :  { %v3719_v40 = vpop.f32.mrf.mxu1  ;;  %3758 = vmatpush3.msra.mxu0 %v1965_v34 }
 0x677   :  { %3759 = vmatprep.subr.mxu0 %v1960_v39  ;;  %v2130_v53 = vadd.f32 %v3733_v21, %v3719_v40 }
 0x678   :  { %v2039_v29 = vpop.f32.mrf.mxu1  ;;  %3760 = vmatpush3.msra.mxu0 %v1960_v39 }
 0x679   :  { %3761 = vmatprep.subr.mxu0 %v1955_v27  ;;  %v2125_v57 = vadd.f32 %v2124_v25, %v2039_v29  ;;  %v2602_v25 = vld [vmem:[%s4370_s15 + $0x8] sm:$0xff]  ;;  %v2601_v29 = vld [vmem:[%s4370_s15] sm:$0xff] }
 0x67a   :  { %v3722_v32 = vpop.f32.mrf.mxu1  ;;  %3762 = vmatpush3.msra.mxu0 %v1955_v27 }
 0x67b   :  { %v2140_v38 = vadd.f32 %v3736_v28, %v3722_v32  ;;  %3763 = vmatprep.subr.mxu0 %v1950_v30 }
 0x67c   :  { %v2049_v51 = vpop.f32.mrf.mxu1  ;;  %3764 = vmatpush3.msra.mxu0 %v1950_v30 }
 0x67d   :  { %v2135_v42 = vadd.f32 %v2134_v49, %v2049_v51  ;;  %3737 = vmatprep.subr.mxu1 %v2140_v38  ;;  %3766 = vmatmul.mubr.msk.f32.vlgmr.msra.gmra.mxu0 %vm740_vm11, %v4075_v47  ;;  %v2379_v47 = vld [vmem:[%s3131_s11 + $0x18] sm:$0xff] }
 0x67e   :  { %3738 = vmatpush3.msra.mxu1 %v2140_v38  ;;  %3768 = vmatprep.mubr.msk.f32.mxu0 %vm740_vm11, %v4080_v50  ;;  %v2378_v50 = vld [vmem:[%s3131_s11 + $0x10] sm:$0xff] }
 0x67f   :  { %3739 = vmatprep.subr.mxu1 %v2135_v42 }
 0x680   :  { %3740 = vmatpush3.msra.mxu1 %v2135_v42 }
 0x681   :  { %3741 = vmatprep.subr.mxu1 %v2130_v53  ;;  %3769 = vmatmul.mubr.msk.f32.gmra.mxu0 %vm740_vm11, %v4085_v52  ;;  %v2377_v52 = vld [vmem:[%s3131_s11 + $0x8] sm:$0xff] }
 0x682   :  { %3742 = vmatpush3.msra.mxu1 %v2130_v53  ;;  %3771 = vmatprep.mubr.msk.f32.mxu0 %vm740_vm11, %v4090_v54  ;;  %v2376_v54 = vld [vmem:[%s3131_s11] sm:$0xff] }
 0x683   :  { %3743 = vmatprep.subr.mxu1 %v2125_v57 }
 0x684   :  { %3744 = vmatpush3.msra.mxu1 %v2125_v57 }
 0x685   :  { %3746 = vmatmul.mubr.msk.f32.vlgmr.msra.gmra.mxu1 %vm740_vm11, %v4127_v31  ;;  %3772 = vmatmul.mubr.msk.f32.gmra.mxu0 %vm740_vm11, %v4095_v56  ;;  %v2604_v56 = vld [vmem:[%s4370_s15 + $0x18] sm:$0xff] }
 0x686   :  { %3748 = vmatprep.mubr.msk.f32.mxu1 %vm740_vm11, %v4130_v33  ;;  %3774 = vmatprep.mubr.msk.f32.mxu0 %vm740_vm11, %v4100_v58 }
 0x687   :  { %3777 = vmatprep.subr.mxu1 %v2379_v47 }
 0x688   :  { %3778 = vmatpush3.msra.mxu1 %v2379_v47 }
 0x689   :  { %3749 = vmatmul.mubr.msk.f32.gmra.mxu1 %vm740_vm11, %v4143_v36  ;;  %3775 = vmatmul.mubr.msk.f32.gmra.mxu0 %vm740_vm11, %v4109_v61 }
 0x68a   :  { %3751 = vmatprep.mubr.msk.f32.mxu1 %vm740_vm11, %v4146_v37  ;;  %3813 = vmatprep.mubr.msk.f32.mxu0 %vm1194_vm5, %v4197_v0 }
 0x68b   :  { %3779 = vmatprep.subr.mxu1 %v2378_v50 }
 0x68c   :  { %3780 = vmatpush3.msra.mxu1 %v2378_v50 }
 0x68d   :  { %3752 = vmatmul.mubr.msk.f32.gmra.mxu1 %vm740_vm11, %v4157_v43  ;;  %3781 = vmatprep.subr.mxu1 %v2377_v52  ;;  %v3249_v43 = vld [vmem:[%s3130_s19] ss:$0 sm:$0xff] }
 0x68e   :  { %3754 = vmatprep.mubr.msk.f32.mxu1 %vm740_vm11, %v4160_v44  ;;  %3782 = vmatpush3.msra.mxu1 %v2377_v52 }
 0x68f   :  { %3783 = vmatprep.subr.mxu1 %v2376_v54 }
 0x690   :  { %3784 = vmatpush3.msra.mxu1 %v2376_v54 }
 0x691   :  { %3755 = vmatmul.mubr.msk.f32.gmra.mxu1 %vm740_vm11, %v4168_v48  ;;  %3833 = vmatprep.subr.mxu1 %v2604_v56 }
 0x73d   :  { %v3767_v58 = vpop.f32.mrf.mxu0 }
 0x73f   :  { %v2314_v61 = vpop.f32.mrf.mxu0 }
 0x741   :  { %v3770_v31 = vpop.f32.mrf.mxu0 }
 0x743   :  { %v2324_v33 = vpop.f32.mrf.mxu0 }
 0x745   :  { %v3747_v36 = vpop.f32.mrf.mxu1  ;;  %v3773_v44 = vpop.f32.mrf.mxu0 }
 0x746   :  { %v2320_v37 = vadd.f32 %v3767_v58, %v3747_v36 }
 0x747   :  { %v2209_v48 = vpop.f32.mrf.mxu1  ;;  %v2334_v3 = vpop.f32.mrf.mxu0 }
 0x748   :  { %v2315_v0 = vadd.f32 %v2314_v61, %v2209_v48  ;;  %v2361_v55 = vadd.f32 %v3249_v43, %v2320_v37  ;;  %v3250_v61 = vld [vmem:[%s3132_s23] ss:$0 sm:$0xff] }
 0x749   :  { %v3750_v63 = vpop.f32.mrf.mxu1  ;;  %v3776_v21 = vpop.f32.mrf.mxu0 }
 0x74a   :  { %v2360_v1 = vadd.f32 %v3249_v43, %v2315_v0  ;;  %v2330_v2 = vadd.f32 %v3770_v31, %v3750_v63  ;;  %v2369_v15 = vmax.f32 %v2361_v55, 0.0  ;;  %v2608_v0 = vld [vmem:[%s3134_s27 + $0x18] sm:$0xff]  ;;  %v2607_v55 = vld [vmem:[%s3134_s27 + $0x10] sm:$0xff]  ;;  %v2606_v63 = vld [vmem:[%s3134_s27 + $0x8] sm:$0xff] }
 0x74b   :  { %v2219_v6 = vpop.f32.mrf.mxu1  ;;  %v2344_v30 = vpop.f32.mrf.mxu0 }
 0x74c   :  { %v2368_v8 = vmax.f32 %v2360_v1, 0.0  ;;  %v2325_v14 = vadd.f32 %v2324_v33, %v2219_v6  ;;  %v2363_v16 = vadd.f32 %v3249_v43, %v2330_v2  ;;  %v2605_v1 = vld [vmem:[%s3134_s27] sm:$0xff]  ;;  %v2808_v6 = vld [vmem:[%s3136_s1 + $0x10] sm:$0xff] }
 0x74d   :  { %v3753_v17 = vpop.f32.mrf.mxu1 }
 0x74e   :  { %v2362_v11 = vadd.f32 %v3249_v43, %v2325_v14  ;;  %v2340_v60 = vadd.f32 %v3773_v44, %v3753_v17  ;;  %3785 = vmatprep.mubr.msk.f32.mxu1 %vm740_vm11, %v2368_v8  ;;  %v2371_v35 = vmax.f32 %v2363_v16, 0.0  ;;  %v2807_v8 = vld [vmem:[%s3136_s1 + $0x8] sm:$0xff]  ;;  %v2806_v14 = vld [vmem:[%s3136_s1] sm:$0xff] }
 0x74f   :  { %v2229_v23 = vpop.f32.mrf.mxu1  ;;  %3786 = vmatmul.mubr.msk.f32.vlgmr.msra.gmra.mxu1 %vm740_vm11, %v2369_v15 }
 0x750   :  { %v2370_v24 = vmax.f32 %v2362_v11, 0.0  ;;  %v2335_v34 = vadd.f32 %v2334_v3, %v2229_v23  ;;  %3834 = vmatpush3.msra.mxu1 %v2604_v56  ;;  %v2365_v39 = vadd.f32 %v3249_v43, %v2340_v60  ;;  %v3271_v60 = vld [vmem:[%s3135_s5] ss:$0 sm:$0xff] }
 0x751   :  { %v3756_v40 = vpop.f32.mrf.mxu1  ;;  %3835 = vmatprep.subr.mxu1 %v2603_v20 }
 0x752   :  { %v2364_v27 = vadd.f32 %v3249_v43, %v2335_v34  ;;  %v2350_v28 = vadd.f32 %v3776_v21, %v3756_v40  ;;  %3788 = vmatprep.mubr.msk.f32.mxu1 %vm740_vm11, %v2370_v24  ;;  %3836 = vmatpush3.msra.mxu1 %v2603_v20  ;;  %v2373_v51 = vmax.f32 %v2365_v39, 0.0 }
 0x753   :  { %v2239_v32 = vpop.f32.mrf.mxu1  ;;  %3789 = vmatmul.mubr.msk.f32.gmra.mxu1 %vm740_vm11, %v2371_v35  ;;  %3837 = vmatprep.subr.mxu1 %v2602_v25 }
 0x754   :  { %v2372_v38 = vmax.f32 %v2364_v27, 0.0  ;;  %v2345_v49 = vadd.f32 %v2344_v30, %v2239_v32  ;;  %3838 = vmatpush3.msra.mxu1 %v2602_v25  ;;  %v2367_v42 = vadd.f32 %v3249_v43, %v2350_v28 }
 0x755   :  { %3839 = vmatprep.subr.mxu1 %v2601_v29 }
 0x756   :  { %v2366_v53 = vadd.f32 %v3249_v43, %v2345_v49  ;;  %3791 = vmatprep.mubr.msk.f32.mxu1 %vm740_vm11, %v2372_v38  ;;  %3840 = vmatpush3.msra.mxu1 %v2601_v29  ;;  %v2375_v47 = vmax.f32 %v2367_v42, 0.0  ;;  %v2920_v42 = vld [vmem:[%s3140_s9 + $0x10] sm:$0xff] }
 0x757   :  { %3792 = vmatmul.mubr.msk.f32.gmra.mxu1 %vm740_vm11, %v2373_v51  ;;  %v2921_v51 = vld [vmem:[%s3140_s9 + $0x18] sm:$0xff] }
 0x758   :  { %v2374_v57 = vmax.f32 %v2366_v53, 0.0  ;;  %3861 = vmatprep.subr.mxu1 %v2921_v51  ;;  %v2919_v53 = vld [vmem:[%s3140_s9 + $0x8] sm:$0xff] }
 0x75a   :  { %3794 = vmatprep.mubr.msk.f32.mxu1 %vm740_vm11, %v2374_v57  ;;  %v2918_v57 = vld [vmem:[%s3140_s9] sm:$0xff] }
 0x75b   :  { %3795 = vmatmul.mubr.msk.f32.gmra.mxu1 %vm740_vm11, %v2375_v47  ;;  %v3272_v47 = vld [vmem:[%s3137_s13] ss:$0 sm:$0xff] }
 0x75c   :  { %3841 = vmatprep.mubr.msk.f32.mxu1 %vm740_vm11, %v4265_v59 }
 0x75f   :  { %3842 = vmatmul.mubr.msk.f32.vlgmr.msra.gmra.mxu1 %vm740_vm11, %v4267_v62 }
 0x760   :  { %3844 = vmatprep.mubr.msk.f32.mxu1 %vm740_vm11, %v4278_v4  ;;  %3862 = vmatpush3.msra.mxu1 %v2921_v51 }
 0x761   :  { %3863 = vmatprep.subr.mxu1 %v2920_v42 }
 0x762   :  { %3864 = vmatpush3.msra.mxu1 %v2920_v42 }
 0x763   :  { %3845 = vmatmul.mubr.msk.f32.gmra.mxu1 %vm740_vm11, %v4280_v5  ;;  %3865 = vmatprep.subr.mxu1 %v2919_v53 }
 0x764   :  { %3866 = vmatpush3.msra.mxu1 %v2919_v53 }
 0x765   :  { %3867 = vmatprep.subr.mxu1 %v2918_v57 }
 0x766   :  { %3868 = vmatpush3.msra.mxu1 %v2918_v57 }
 0x80f   :  { %v3787_v50 = vpop.f32.mrf.mxu1 }
 0x810   :  { %v2483_v44 = vadd.f32 %v3787_v50, %v3250_v61 }
 0x811   :  { %v2477_v52 = vpop.f32.mrf.mxu1 }
 0x812   :  { %v2478_v48 = vadd.f32 %v3250_v61, %v2477_v52 }
 0x813   :  { %v3790_v54 = vpop.f32.mrf.mxu1 }
 0x814   :  { %v2493_v37 = vadd.f32 %v3790_v54, %v3250_v61 }
 0x815   :  { %v2487_v56 = vpop.f32.mrf.mxu1 }
 0x816   :  { %v2488_v43 = vadd.f32 %v3250_v61, %v2487_v56 }
 0x817   :  { %v3793_v58 = vpop.f32.mrf.mxu1 }
 0x818   :  { %v2503_v4 = vadd.f32 %v3793_v58, %v3250_v61 }
 0x819   :  { %v2497_v59 = vpop.f32.mrf.mxu1 }
 0x81a   :  { %v2498_v5 = vadd.f32 %v3250_v61, %v2497_v59 }
 0x81b   :  { %v3796_v31 = vpop.f32.mrf.mxu1 }
 0x81c   :  { %v2513_v62 = vadd.f32 %v3796_v31, %v3250_v61 }
 0x81d   :  { %v2507_v33 = vpop.f32.mrf.mxu1 }
 0x81e   :  { %v2508_v36 = vadd.f32 %v3250_v61, %v2507_v33  ;;  %3797 = vmatprep.subr.mxu0 %v2513_v62 }
 0x81f   :  { %3798 = vmatpush3.msra.mxu0 %v2513_v62  ;;  %v3843_v15 = vpop.f32.mrf.mxu1 }
 0x820   :  { %3799 = vmatprep.subr.mxu0 %v2508_v36 }
 0x821   :  { %3800 = vmatpush3.msra.mxu0 %v2508_v36  ;;  %v2772_v16 = vpop.f32.mrf.mxu1 }
 0x822   :  { %3801 = vmatprep.subr.mxu0 %v2503_v4 }
 0x823   :  { %3802 = vmatpush3.msra.mxu0 %v2503_v4  ;;  %v3846_v20 = vpop.f32.mrf.mxu1 }
 0x824   :  { %3803 = vmatprep.subr.mxu0 %v2498_v5 }
 0x825   :  { %3804 = vmatpush3.msra.mxu0 %v2498_v5  ;;  %v2782_v39 = vpop.f32.mrf.mxu1 }
 0x826   :  { %3805 = vmatprep.subr.mxu0 %v2493_v37 }
 0x827   :  { %3806 = vmatpush3.msra.mxu0 %v2493_v37 }
 0x828   :  { %3807 = vmatprep.subr.mxu0 %v2488_v43 }
 0x829   :  { %3808 = vmatpush3.msra.mxu0 %v2488_v43  ;;  %v1790_v43 = vadd.f32 %v4324_v7, %v4330_v10 }
 0x82a   :  { %3809 = vmatprep.subr.mxu0 %v2483_v44 }
 0x82b   :  { %3810 = vmatpush3.msra.mxu0 %v2483_v44 }
 0x82c   :  { %3811 = vmatprep.subr.mxu0 %v2478_v48 }
 0x82d   :  { %3812 = vmatpush3.msra.mxu0 %v2478_v48  ;;  %v245_v48 = vshrl.u32 %v146_v41, 7 }
 0x82e   :  { %3814 = vmatmul.mubr.msk.f32.vlgmr.msra.gmra.mxu0 %vm1194_vm5, %v4204_v18  ;;  %3819 = vmatprep.subr.mxu0 %v2608_v0 }
 0x82f   :  { %3816 = vmatprep.mubr.msk.f32.mxu0 %vm1194_vm5, %v4209_v22  ;;  %3820 = vmatpush3.msra.mxu0 %v2608_v0 }
 0x830   :  { %3821 = vmatprep.subr.mxu0 %v2607_v55 }
 0x831   :  { %3822 = vmatpush3.msra.mxu0 %v2607_v55  ;;  %v3143_v55 = vld [vmem:[%s3111_s17] ss:$0 sm:$0xff] }
 0x832   :  { %3817 = vmatmul.mubr.msk.f32.gmra.mxu0 %vm1194_vm5, %v4215_v26  ;;  %3823 = vmatprep.subr.mxu0 %v2606_v63  ;;  %v2809_v26 = vld [vmem:[%s3136_s1 + $0x18] sm:$0xff]  ;;  %vm251_vm1 = vcmp.eq.s32.totalorder %v245_v48, %v3143_v55 }
 0x833   :  { %3824 = vmatpush3.msra.mxu0 %v2606_v63  ;;  %v252_v7 = vsel %vm251_vm1, 1.0, %v3936_v45 }
 0x834   :  { %3825 = vmatprep.subr.mxu0 %v2605_v1 }
 0x835   :  { %3826 = vmatpush3.msra.mxu0 %v2605_v1  ;;  %v1780_v1 = vadd.f32 %v4320_v12, %v4326_v46  ;;  %v3281_v12 = vld [vmem:[%s3141_s21] ss:$0 sm:$0xff] }
 0x836   :  { %3847 = vmatprep.subr.mxu0 %v2809_v26 }
 0x8ee   :  { %v3815_v2 = vpop.f32.mrf.mxu0 }
 0x8f0   :  { %v2582_v3 = vpop.f32.mrf.mxu0 }
 0x8f1   :  { %3827 = vmatprep.mubr.msk.f32.mxu0 %vm740_vm11, %v2582_v3  ;;  %v1775_v3 = vadd.f32 %v4322_v13, %v4328_v9 }
 0x8f2   :  { %v3818_v18 = vpop.f32.mrf.mxu0  ;;  %3828 = vmatmul.mubr.msk.f32.vlgmr.msra.gmra.mxu0 %vm740_vm11, %v3815_v2 }
 0x8f3   :  { %3848 = vmatpush3.msra.mxu0 %v2809_v26 }
 0x8f4   :  { %v2592_v22 = vpop.f32.mrf.mxu0  ;;  %3849 = vmatprep.subr.mxu0 %v2808_v6 }
 0x8f5   :  { %3830 = vmatprep.mubr.msk.f32.mxu0 %vm740_vm11, %v2592_v22  ;;  %3850 = vmatpush3.msra.mxu0 %v2808_v6 }
 0x8f6   :  { %3831 = vmatmul.mubr.msk.f32.gmra.mxu0 %vm740_vm11, %v3818_v18  ;;  %3851 = vmatprep.subr.mxu0 %v2807_v8 }
 0x8f7   :  { %3852 = vmatpush3.msra.mxu0 %v2807_v8 }
 0x8f8   :  { %3853 = vmatprep.subr.mxu0 %v2806_v14 }
 0x8f9   :  { %3854 = vmatpush3.msra.mxu0 %v2806_v14 }
 0x8fa   :  { %3875 = vmatprep.subr.mxu0 %v3936_v45 }
 0x9b2   :  { %v3829_v17 = vpop.f32.mrf.mxu0 }
 0x9b3   :  { %v2778_v11 = vadd.f32 %v3843_v15, %v3829_v17 }
 0x9b4   :  { %v2687_v21 = vpop.f32.mrf.mxu0 }
 0x9b5   :  { %v2773_v23 = vadd.f32 %v2772_v16, %v2687_v21  ;;  %v2799_v24 = vadd.f32 %v3271_v60, %v2778_v11 }
 0x9b6   :  { %v3832_v34 = vpop.f32.mrf.mxu0 }
 0x9b7   :  { %v2798_v25 = vadd.f32 %v3271_v60, %v2773_v23  ;;  %v2788_v35 = vadd.f32 %v3846_v20, %v3832_v34  ;;  %v2803_v29 = vmax.f32 %v2799_v24, 0.0 }
 0x9b8   :  { %v2697_v40 = vpop.f32.mrf.mxu0 }
 0x9b9   :  { %v2802_v27 = vmax.f32 %v2798_v25, 0.0  ;;  %v2783_v28 = vadd.f32 %v2782_v39, %v2697_v40  ;;  %v2801_v30 = vadd.f32 %v3271_v60, %v2788_v35 }
 0x9bb   :  { %v2800_v32 = vadd.f32 %v3271_v60, %v2783_v28  ;;  %3855 = vmatprep.mubr.msk.f32.mxu0 %vm740_vm11, %v2802_v27  ;;  %v2805_v49 = vmax.f32 %v2801_v30, 0.0 }
 0x9bc   :  { %3856 = vmatmul.mubr.msk.f32.vlgmr.msra.gmra.mxu0 %vm740_vm11, %v2803_v29 }
 0x9bd   :  { %v2804_v38 = vmax.f32 %v2800_v32, 0.0 }
 0x9bf   :  { %3858 = vmatprep.mubr.msk.f32.mxu0 %vm740_vm11, %v2804_v38 }
 0x9c0   :  { %3859 = vmatmul.mubr.msk.f32.gmra.mxu0 %vm740_vm11, %v2805_v49 }
 0x9c1   :  { %3883 = vmatprep.mubr.msk.f32.mxu0 %vm3960_vm0, %v3936_v45 }
 0xa7c   :  { %v3857_v50 = vpop.f32.mrf.mxu0 }
 0xa7d   :  { %v2901_v52 = vadd.f32 %v3857_v50, %v3272_v47 }
 0xa7e   :  { %v2895_v54 = vpop.f32.mrf.mxu0 }
 0xa7f   :  { %v2896_v56 = vadd.f32 %v3272_v47, %v2895_v54  ;;  %v2915_v61 = vmax.f32 %v2901_v52, 0.0 }
 0xa80   :  { %v3860_v58 = vpop.f32.mrf.mxu0 }
 0xa81   :  { %v2914_v59 = vmax.f32 %v2896_v56, 0.0  ;;  %v2911_v31 = vadd.f32 %v3860_v58, %v3272_v47 }
 0xa82   :  { %v2905_v62 = vpop.f32.mrf.mxu0 }
 0xa83   :  { %v2906_v33 = vadd.f32 %v3272_v47, %v2905_v62  ;;  %3869 = vmatprep.mubr.msk.f32.mxu1 %vm740_vm11, %v2914_v59  ;;  %v2917_v4 = vmax.f32 %v2911_v31, 0.0 }
 0xa84   :  { %3870 = vmatmul.mubr.msk.f32.vlgmr.msra.gmra.mxu1 %vm740_vm11, %v2915_v61 }
 0xa85   :  { %v2916_v36 = vmax.f32 %v2906_v33, 0.0 }
 0xa87   :  { %3872 = vmatprep.mubr.msk.f32.mxu1 %vm740_vm11, %v2916_v36 }
 0xa88   :  { %3873 = vmatmul.mubr.msk.f32.gmra.mxu1 %vm740_vm11, %v2917_v4 }
 0xb44   :  { %v3871_v5 = vpop.f32.mrf.mxu1 }
 0xb45   :  { %v3020_v18 = vadd.f32 %v3871_v5, %v1780_v1 }
 0xb46   :  { %v3000_v37 = vpop.f32.mrf.mxu1 }
 0xb47   :  { %v3019_v41 = vadd.f32 %v3000_v37, %v1775_v3 }
 0xb48   :  { %v3874_v44 = vpop.f32.mrf.mxu1 }
 0xb49   :  { %v3022_v0 = vadd.f32 %v3874_v44, %v1790_v43 }
 0xb4a   :  { %v3010_v63 = vpop.f32.mrf.mxu1 }
 0xb4b   :  { %v3021_v2 = vadd.f32 %v3010_v63, %v4332_v19  ;;  %3876 = vmatpush3.msra.mxu0 %v3022_v0 }
 0xb4c   :  { %3877 = vmatprep.subr.mxu0 %v3936_v45 }
 0xb4d   :  { %3878 = vmatpush3.msra.mxu0 %v3021_v2 }
 0xb4e   :  { %3879 = vmatprep.subr.mxu0 %v3936_v45 }
 0xb4f   :  { %3880 = vmatpush3.msra.mxu0 %v3020_v18 }
 0xb50   :  { %3881 = vmatprep.subr.mxu0 %v3936_v45 }
 0xb51   :  { %3882 = vmatpush3.msra.mxu0 %v3019_v41 }
 0xb52   :  { %3884 = vmatmul.mubr.msk.f32.vlgmr.msra.gmra.mxu0 %vm740_vm11, %v252_v7 }
 0xc12   :  { %v3099_v13 = vpop.f32.mrf.mxu0 }
 0xc13   :  { %v3100_v46 = vadd.f32 %v3281_v12, %v3099_v13 }
 0xc14   :  { %v3885_v9 = vpop.f32.mrf.mxu0 }
 0xc15   :  { %3103 = vst [vmem:[%s3142_s25] sm:$0xff] %v3100_v46 }

</bundles_post_ra>
